<compile_context>
chip_gen: v6e
topology: v6e:2x2x1
jax: 0.10.0
libtpu: 0.0.40
codegen_flags: <defaults>
</compile_context>

<pallas_src>
import jax
import jax.numpy as jnp
from jax.experimental import pallas as pl
from jax.experimental.pallas import tpu as pltpu


# ----------------------------- Model config -------------------------------

B, T = 2, 2
C, H, W = 3, 16, 16          # CLIP pixel_values are 3-channel
PATCH = 8
NUM_PATCHES = (H // PATCH) * (W // PATCH)    # 4
SEQ = NUM_PATCHES + 1                        # 5 (with CLS token)
KP = C * PATCH * PATCH                       # 192 (torch Conv2d (C, kh, kw) flattening)
HIDDEN = 32
HEADS = 2
HEAD_DIM = HIDDEN // HEADS
INTER = 64
LAYERS = 2
PROJ = 16
EPS = 1e-5

MXU_DTYPE = jnp.bfloat16     # MXU operand dtype; accumulation stays float32


# ----------------------------- Fused kernel -------------------------------

def _clip_forward_kernel(patches_ref, wpatch_ref, embadd_ref, preln_ref,
                         ln1_ref, wqkv_ref, bqkv_ref, wo_ref, bo_ref,
                         ln2_ref, w1_ref, b1_ref, w2_ref, b2_ref,
                         postln_ref, vproj_ref, o_ref):
    f32 = jnp.float32

    def mm(a, b):
        # MXU matmul: bf16 operands, f32 accumulation.
        return jnp.dot(a.astype(MXU_DTYPE), b.astype(MXU_DTYPE),
                       preferred_element_type=f32)

    def mm_t(a, b):
        # a @ b.T with bf16 operands, f32 accumulation (no explicit transpose).
        return jax.lax.dot_general(
            a.astype(MXU_DTYPE), b.astype(MXU_DTYPE),
            dimension_numbers=(((1,), (1,)), ((), ())),
            preferred_element_type=f32)

    def layer_norm(x, gb):
        g = gb[0:1, :].astype(f32)
        b = gb[1:2, :].astype(f32)
        mu = jnp.mean(x, axis=-1, keepdims=True)
        var = jnp.mean(jnp.square(x - mu), axis=-1, keepdims=True)
        return (x - mu) * jax.lax.rsqrt(var + EPS) * g + b

    # --- patch embedding + class token + position embeddings (one matmul) ---
    # Row 0 of `patches` is all-zero (class-token slot); embadd row 0 already
    # contains class_emb + pos_emb[0], rows 1.. contain pos_emb[1:].
    emb = mm(patches_ref[0], wpatch_ref[...]) + embadd_ref[...]        # (SEQ, HIDDEN)
    h = layer_norm(emb, preln_ref[...])                                # pre-LayerNorm

    scale = HEAD_DIM ** -0.5
    for l in range(LAYERS):
        # --------------------------- self-attention ------------------------
        xln = layer_norm(h, ln1_ref[l])
        qkv = mm(xln, wqkv_ref[l]) + bqkv_ref[l].astype(f32)           # (SEQ, 3*HIDDEN)
        q = qkv[:, 0:HIDDEN] * scale
        k = qkv[:, HIDDEN:2 * HIDDEN]
        v = qkv[:, 2 * HIDDEN:3 * HIDDEN]

        wo_l = wo_ref[l]                                               # (HIDDEN, HIDDEN)
        acc = bo_ref[l].astype(f32)                                    # (1, HIDDEN) -> broadcast
        for hh in range(HEADS):
            sl = slice(hh * HEAD_DIM, (hh + 1) * HEAD_DIM)
            s = mm_t(q[:, sl], k[:, sl])                               # (SEQ, SEQ)
            m = jnp.max(s, axis=-1, keepdims=True)
            p = jnp.exp(s - m)
            denom = jnp.sum(p, axis=-1, keepdims=True)
            p = p * pl.reciprocal(denom, approx=True)                  # EUP slot
            out_h = mm(p, v[:, sl])                                    # (SEQ, HEAD_DIM)
            # attn @ Wo == sum_h out_h @ Wo[h*HD:(h+1)*HD, :]  (no concat needed)
            acc = acc + mm(out_h, wo_l[sl, :])                         # (SEQ, HIDDEN)
        h = h + acc                                                    # residual

        # ------------------------- MLP (QuickGELU) -------------------------
        xln = layer_norm(h, ln2_ref[l])
        m1 = mm(xln, w1_ref[l]) + b1_ref[l].astype(f32)                # (SEQ, INTER)
        m1 = m1 * jax.nn.sigmoid(1.702 * m1)                          # fused QuickGELU
        h = h + mm(m1, w2_ref[l]) + b2_ref[l].astype(f32)              # residual

    # --- post-LN + bias-free visual projection; CLS row selected at the end ---
    hn = layer_norm(h, postln_ref[...])
    feats = mm(hn, vproj_ref[...])                                     # (SEQ, PROJ)
    o_ref[...] = feats[0:1, :].reshape(1, 1, PROJ).astype(o_ref.dtype)


# ----------------------------- Parameters ----------------------------------

def init_params(key):
    def nrm(k, shape, scale=0.02):
        return scale * jax.random.normal(k, shape, dtype=jnp.float32)

    keys = iter(jax.random.split(key, 64))
    p = {}
    p["patch_w"] = nrm(next(keys), (HIDDEN, C, PATCH, PATCH))   # torch conv weight layout
    p["class_emb"] = nrm(next(keys), (HIDDEN,))
    p["pos_emb"] = nrm(next(keys), (SEQ, HIDDEN))
    p["pre_ln_g"] = jnp.ones((HIDDEN,), jnp.float32)
    p["pre_ln_b"] = jnp.zeros((HIDDEN,), jnp.float32)
    p["layers"] = []
    for _ in range(LAYERS):
        lyr = {
            "ln1_g": jnp.ones((HIDDEN,), jnp.float32),
            "ln1_b": jnp.zeros((HIDDEN,), jnp.float32),
            "wq": nrm(next(keys), (HIDDEN, HIDDEN)), "bq": nrm(next(keys), (HIDDEN,)),
            "wk": nrm(next(keys), (HIDDEN, HIDDEN)), "bk": nrm(next(keys), (HIDDEN,)),
            "wv": nrm(next(keys), (HIDDEN, HIDDEN)), "bv": nrm(next(keys), (HIDDEN,)),
            "wo": nrm(next(keys), (HIDDEN, HIDDEN)), "bo": nrm(next(keys), (HIDDEN,)),
            "ln2_g": jnp.ones((HIDDEN,), jnp.float32),
            "ln2_b": jnp.zeros((HIDDEN,), jnp.float32),
            "w1": nrm(next(keys), (HIDDEN, INTER)), "b1": nrm(next(keys), (INTER,)),
            "w2": nrm(next(keys), (INTER, HIDDEN)), "b2": nrm(next(keys), (HIDDEN,)),
        }
        p["layers"].append(lyr)
    p["post_ln_g"] = jnp.ones((HIDDEN,), jnp.float32)
    p["post_ln_b"] = jnp.zeros((HIDDEN,), jnp.float32)
    p["vis_proj"] = nrm(next(keys), (HIDDEN, PROJ))              # bias-free visual projection
    return p


def _pack_params(params):
    """Stack per-layer tensors (leading LAYERS axis), fuse QKV, pre-cast MXU weights to bf16."""
    layers = params["layers"]
    stk = lambda name: jnp.stack([l[name] for l in layers])

    w_patch = params["patch_w"].reshape(HIDDEN, KP).T.astype(MXU_DTYPE)         # (KP, HIDDEN)
    embed_add = params["pos_emb"].at[0].add(params["class_emb"])                # (SEQ, HIDDEN)
    pre_ln = jnp.stack([params["pre_ln_g"], params["pre_ln_b"]])                # (2, HIDDEN)
    ln1 = jnp.stack([jnp.stack([l["ln1_g"], l["ln1_b"]]) for l in layers])      # (L, 2, HIDDEN)
    w_qkv = jnp.stack([jnp.concatenate([l["wq"], l["wk"], l["wv"]], axis=1)
                       for l in layers]).astype(MXU_DTYPE)                      # (L, HIDDEN, 3H)
    b_qkv = jnp.stack([jnp.concatenate([l["bq"], l["bk"], l["bv"]])[None, :]
                       for l in layers])                                        # (L, 1, 3H)
    wo = stk("wo").astype(MXU_DTYPE)                                            # (L, HIDDEN, HIDDEN)
    bo = stk("bo")[:, None, :]                                                  # (L, 1, HIDDEN)
    ln2 = jnp.stack([jnp.stack([l["ln2_g"], l["ln2_b"]]) for l in layers])      # (L, 2, HIDDEN)
    w1 = stk("w1").astype(MXU_DTYPE)                                            # (L, HIDDEN, INTER)
    b1 = stk("b1")[:, None, :]                                                  # (L, 1, INTER)
    w2 = stk("w2").astype(MXU_DTYPE)                                            # (L, INTER, HIDDEN)
    b2 = stk("b2")[:, None, :]                                                  # (L, 1, HIDDEN)
    post_ln = jnp.stack([params["post_ln_g"], params["post_ln_b"]])             # (2, HIDDEN)
    vis_proj = params["vis_proj"].astype(MXU_DTYPE)                             # (HIDDEN, PROJ)
    return (w_patch, embed_add, pre_ln, ln1, w_qkv, b_qkv, wo, bo, ln2,
            w1, b1, w2, b2, post_ln, vis_proj)


# ----------------------------- Forward pass --------------------------------

def feature_extractor_forward(x, params):
    """x: (B, T, C, H, W) float32 -> (B, T, PROJ) float32  (CLIP get_image_features)."""
    Bx, Tx = x.shape[0], x.shape[1]
    N = Bx * Tx
    xf = x.reshape(N, C, H, W)                                   # torch.flatten(0, 1)

    # Patch extraction: rows are patches (row-major over (ph, pw)), K axis is
    # flattened (C, kh, kw) to match torch.nn.Conv2d weight ordering.
    nh, nw = H // PATCH, W // PATCH
    patches = xf.reshape(N, C, nh, PATCH, nw, PATCH)
    patches = patches.transpose(0, 2, 4, 1, 3, 5).reshape(N, NUM_PATCHES, KP)
    # Prepend an all-zero "patch" row per image for the class-token slot so the
    # in-kernel patch-embed matmul also produces row 0 (= 0) and the fused
    # class-token + position-embedding add handles the rest.
    patches = jnp.pad(patches, ((0, 0), (1, 0), (0, 0))).astype(MXU_DTYPE)   # (N, SEQ, KP)

    packed = _pack_params(params)

    def full_spec(arr):
        shape = arr.shape
        return pl.BlockSpec(shape, lambda i: (0,) * len(shape))   # resident weight block

    in_specs = [pl.BlockSpec((1, SEQ, KP), lambda i: (i, 0, 0))]
    in_specs += [full_spec(a) for a in packed]

    out = pl.pallas_call(
        _clip_forward_kernel,
        out_shape=jax.ShapeDtypeStruct((N, 1, PROJ), jnp.float32),
        grid=(N,),
        in_specs=in_specs,
        out_specs=pl.BlockSpec((1, 1, PROJ), lambda i: (i, 0, 0)),
        compiler_params=pltpu.CompilerParams(
            dimension_semantics=("parallel",)),                   # v7x: use both TCs
    )(patches, *packed)

    return out.reshape(Bx, Tx, PROJ)                              # torch.unflatten(0, (B, T))


# --------------------------------- Main -------------------------------------

if __name__ == "__main__":
    key = jax.random.PRNGKey(0)
    k_param, k_data = jax.random.split(key)
    params = init_params(k_param)
    x = jax.random.normal(k_data, (B, T, C, H, W), dtype=jnp.float32)

    fwd = jax.jit(feature_extractor_forward)
    out = jax.block_until_ready(fwd(x, params))

    assert out.shape == (B, T, PROJ), out.shape
    assert bool(jnp.all(jnp.isfinite(out)))
    print("KERNEL_OK")
</pallas_src>

<mosaic_0001>
module attributes {stable_mosaic.version = 11 : i64} {
  func.func @_clip_forward_kernel(%arg0: i32, %arg1: memref<1x5x192xbf16, #tpu.memory_space<vmem>>, %arg2: memref<192x32xbf16, #tpu.memory_space<vmem>>, %arg3: memref<5x32xf32, #tpu.memory_space<vmem>>, %arg4: memref<2x32xf32, #tpu.memory_space<vmem>>, %arg5: memref<2x2x32xf32, #tpu.memory_space<vmem>>, %arg6: memref<2x32x96xbf16, #tpu.memory_space<vmem>>, %arg7: memref<2x1x96xf32, #tpu.memory_space<vmem>>, %arg8: memref<2x32x32xbf16, #tpu.memory_space<vmem>>, %arg9: memref<2x1x32xf32, #tpu.memory_space<vmem>>, %arg10: memref<2x2x32xf32, #tpu.memory_space<vmem>>, %arg11: memref<2x32x64xbf16, #tpu.memory_space<vmem>>, %arg12: memref<2x1x64xf32, #tpu.memory_space<vmem>>, %arg13: memref<2x64x32xbf16, #tpu.memory_space<vmem>>, %arg14: memref<2x1x32xf32, #tpu.memory_space<vmem>>, %arg15: memref<2x32xf32, #tpu.memory_space<vmem>>, %arg16: memref<32x16xbf16, #tpu.memory_space<vmem>>, %arg17: memref<1x1x16xf32, #tpu.memory_space<vmem>>) attributes {dimension_semantics = [#tpu.dimension_semantics<parallel>], iteration_bounds = array<i64: 4>, scalar_prefetch = 0 : i64, scratch_operands = 0 : i64, tpu.core_type = #tpu.core_type<tc>, window_params = [{transform_indices = @transform_0, window_bounds = array<i64: 1, 5, 192>}, {pipeline_mode = #tpu.pipeline_mode<synchronous>, transform_indices = @transform_1, window_bounds = array<i64: 192, 32>}, {pipeline_mode = #tpu.pipeline_mode<synchronous>, transform_indices = @transform_2, window_bounds = array<i64: 5, 32>}, {pipeline_mode = #tpu.pipeline_mode<synchronous>, transform_indices = @transform_3, window_bounds = array<i64: 2, 32>}, {pipeline_mode = #tpu.pipeline_mode<synchronous>, transform_indices = @transform_4, window_bounds = array<i64: 2, 2, 32>}, {pipeline_mode = #tpu.pipeline_mode<synchronous>, transform_indices = @transform_5, window_bounds = array<i64: 2, 32, 96>}, {pipeline_mode = #tpu.pipeline_mode<synchronous>, transform_indices = @transform_6, window_bounds = array<i64: 2, 1, 96>}, {pipeline_mode = #tpu.pipeline_mode<synchronous>, transform_indices = @transform_7, window_bounds = array<i64: 2, 32, 32>}, {pipeline_mode = #tpu.pipeline_mode<synchronous>, transform_indices = @transform_8, window_bounds = array<i64: 2, 1, 32>}, {pipeline_mode = #tpu.pipeline_mode<synchronous>, transform_indices = @transform_9, window_bounds = array<i64: 2, 2, 32>}, {pipeline_mode = #tpu.pipeline_mode<synchronous>, transform_indices = @transform_10, window_bounds = array<i64: 2, 32, 64>}, {pipeline_mode = #tpu.pipeline_mode<synchronous>, transform_indices = @transform_11, window_bounds = array<i64: 2, 1, 64>}, {pipeline_mode = #tpu.pipeline_mode<synchronous>, transform_indices = @transform_12, window_bounds = array<i64: 2, 64, 32>}, {pipeline_mode = #tpu.pipeline_mode<synchronous>, transform_indices = @transform_13, window_bounds = array<i64: 2, 1, 32>}, {pipeline_mode = #tpu.pipeline_mode<synchronous>, transform_indices = @transform_14, window_bounds = array<i64: 2, 32>}, {pipeline_mode = #tpu.pipeline_mode<synchronous>, transform_indices = @transform_15, window_bounds = array<i64: 32, 16>}, {transform_indices = @transform_16, window_bounds = array<i64: 1, 1, 16>}]} {
    %c0 = arith.constant 0 : index
    %c0_0 = arith.constant 0 : index
    %c0_1 = arith.constant 0 : index
    %0 = vector.load %arg1[%c0, %c0_0, %c0_1] : memref<1x5x192xbf16, #tpu.memory_space<vmem>>, vector<1x5x192xbf16>
    %1 = vector.shape_cast %0 : vector<1x5x192xbf16> to vector<5x192xbf16>
    %c0_2 = arith.constant 0 : index
    %c0_3 = arith.constant 0 : index
    %2 = vector.load %arg2[%c0_2, %c0_3] : memref<192x32xbf16, #tpu.memory_space<vmem>>, vector<192x32xbf16>
    %cst = arith.constant dense<0.000000e+00> : vector<5x32xf32>
    %3 = tpu.matmul %1, %2, %cst {dimension_numbers = #tpu.dot_dimension_numbers<[1], [0], [0], [1], [0, 0, 1, 1], [], []>} : vector<5x192xbf16>, vector<192x32xbf16>, vector<5x32xf32> -> vector<5x32xf32>
    %c0_4 = arith.constant 0 : index
    %c0_5 = arith.constant 0 : index
    %4 = vector.load %arg3[%c0_4, %c0_5] : memref<5x32xf32, #tpu.memory_space<vmem>>, vector<5x32xf32>
    %5 = arith.addf %3, %4 : vector<5x32xf32>
    %c0_6 = arith.constant 0 : index
    %c0_7 = arith.constant 0 : index
    %6 = vector.load %arg4[%c0_6, %c0_7] : memref<2x32xf32, #tpu.memory_space<vmem>>, vector<2x32xf32>
    %7 = vector.extract_strided_slice %6 {offsets = [0, 0], sizes = [1, 32], strides = [1, 1]} : vector<2x32xf32> to vector<1x32xf32>
    %8 = vector.extract_strided_slice %6 {offsets = [1, 0], sizes = [1, 32], strides = [1, 1]} : vector<2x32xf32> to vector<1x32xf32>
    %cst_8 = arith.constant dense<0.000000e+00> : vector<5xf32>
    %9 = vector.multi_reduction <add>, %5, %cst_8 [1] : vector<5x32xf32> to vector<5xf32>
    %10 = vector.shape_cast %9 : vector<5xf32> to vector<5x1xf32>
    %cst_9 = arith.constant 3.200000e+01 : f32
    %11 = vector.broadcast %cst_9 : f32 to vector<5x1xf32>
    %12 = arith.divf %10, %11 : vector<5x1xf32>
    %13 = vector.broadcast %12 : vector<5x1xf32> to vector<5x32xf32>
    %14 = arith.subf %5, %13 : vector<5x32xf32>
    %15 = arith.mulf %14, %14 : vector<5x32xf32>
    %cst_10 = arith.constant dense<0.000000e+00> : vector<5xf32>
    %16 = vector.multi_reduction <add>, %15, %cst_10 [1] : vector<5x32xf32> to vector<5xf32>
    %17 = vector.shape_cast %16 : vector<5xf32> to vector<5x1xf32>
    %cst_11 = arith.constant 3.200000e+01 : f32
    %18 = vector.broadcast %cst_11 : f32 to vector<5x1xf32>
    %19 = arith.divf %17, %18 : vector<5x1xf32>
    %20 = vector.broadcast %12 : vector<5x1xf32> to vector<5x32xf32>
    %21 = arith.subf %5, %20 : vector<5x32xf32>
    %cst_12 = arith.constant 9.99999974E-6 : f32
    %22 = vector.broadcast %cst_12 : f32 to vector<5x1xf32>
    %23 = arith.addf %19, %22 : vector<5x1xf32>
    %24 = math.rsqrt %23 : vector<5x1xf32>
    %25 = vector.broadcast %24 : vector<5x1xf32> to vector<5x32xf32>
    %26 = arith.mulf %21, %25 : vector<5x32xf32>
    %27 = vector.broadcast %7 : vector<1x32xf32> to vector<5x32xf32>
    %28 = arith.mulf %26, %27 : vector<5x32xf32>
    %29 = vector.broadcast %8 : vector<1x32xf32> to vector<5x32xf32>
    %30 = arith.addf %28, %29 : vector<5x32xf32>
    %c0_13 = arith.constant 0 : index
    %c0_14 = arith.constant 0 : index
    %c0_15 = arith.constant 0 : index
    %31 = vector.load %arg5[%c0_13, %c0_14, %c0_15] : memref<2x2x32xf32, #tpu.memory_space<vmem>>, vector<1x2x32xf32>
    %32 = vector.shape_cast %31 : vector<1x2x32xf32> to vector<2x32xf32>
    %33 = vector.extract_strided_slice %32 {offsets = [0, 0], sizes = [1, 32], strides = [1, 1]} : vector<2x32xf32> to vector<1x32xf32>
    %34 = vector.extract_strided_slice %32 {offsets = [1, 0], sizes = [1, 32], strides = [1, 1]} : vector<2x32xf32> to vector<1x32xf32>
    %cst_16 = arith.constant dense<0.000000e+00> : vector<5xf32>
    %35 = vector.multi_reduction <add>, %30, %cst_16 [1] : vector<5x32xf32> to vector<5xf32>
    %36 = vector.shape_cast %35 : vector<5xf32> to vector<5x1xf32>
    %cst_17 = arith.constant 3.200000e+01 : f32
    %37 = vector.broadcast %cst_17 : f32 to vector<5x1xf32>
    %38 = arith.divf %36, %37 : vector<5x1xf32>
    %39 = vector.broadcast %38 : vector<5x1xf32> to vector<5x32xf32>
    %40 = arith.subf %30, %39 : vector<5x32xf32>
    %41 = arith.mulf %40, %40 : vector<5x32xf32>
    %cst_18 = arith.constant dense<0.000000e+00> : vector<5xf32>
    %42 = vector.multi_reduction <add>, %41, %cst_18 [1] : vector<5x32xf32> to vector<5xf32>
    %43 = vector.shape_cast %42 : vector<5xf32> to vector<5x1xf32>
    %cst_19 = arith.constant 3.200000e+01 : f32
    %44 = vector.broadcast %cst_19 : f32 to vector<5x1xf32>
    %45 = arith.divf %43, %44 : vector<5x1xf32>
    %46 = vector.broadcast %38 : vector<5x1xf32> to vector<5x32xf32>
    %47 = arith.subf %30, %46 : vector<5x32xf32>
    %cst_20 = arith.constant 9.99999974E-6 : f32
    %48 = vector.broadcast %cst_20 : f32 to vector<5x1xf32>
    %49 = arith.addf %45, %48 : vector<5x1xf32>
    %50 = math.rsqrt %49 : vector<5x1xf32>
    %51 = vector.broadcast %50 : vector<5x1xf32> to vector<5x32xf32>
    %52 = arith.mulf %47, %51 : vector<5x32xf32>
    %53 = vector.broadcast %33 : vector<1x32xf32> to vector<5x32xf32>
    %54 = arith.mulf %52, %53 : vector<5x32xf32>
    %55 = vector.broadcast %34 : vector<1x32xf32> to vector<5x32xf32>
    %56 = arith.addf %54, %55 : vector<5x32xf32>
    %c0_21 = arith.constant 0 : index
    %c0_22 = arith.constant 0 : index
    %c0_23 = arith.constant 0 : index
    %57 = vector.load %arg6[%c0_21, %c0_22, %c0_23] : memref<2x32x96xbf16, #tpu.memory_space<vmem>>, vector<1x32x96xbf16>
    %58 = vector.shape_cast %57 : vector<1x32x96xbf16> to vector<32x96xbf16>
    %59 = arith.truncf %56 : vector<5x32xf32> to vector<5x32xbf16>
    %cst_24 = arith.constant dense<0.000000e+00> : vector<5x96xf32>
    %60 = tpu.matmul %59, %58, %cst_24 {dimension_numbers = #tpu.dot_dimension_numbers<[1], [0], [0], [1], [0, 0, 1, 1], [], []>} : vector<5x32xbf16>, vector<32x96xbf16>, vector<5x96xf32> -> vector<5x96xf32>
    %c0_25 = arith.constant 0 : index
    %c0_26 = arith.constant 0 : index
    %c0_27 = arith.constant 0 : index
    %61 = vector.load %arg7[%c0_25, %c0_26, %c0_27] : memref<2x1x96xf32, #tpu.memory_space<vmem>>, vector<1x1x96xf32>
    %62 = vector.shape_cast %61 : vector<1x1x96xf32> to vector<1x96xf32>
    %63 = vector.broadcast %62 : vector<1x96xf32> to vector<5x96xf32>
    %64 = arith.addf %60, %63 : vector<5x96xf32>
    %65 = vector.extract_strided_slice %64 {offsets = [0, 0], sizes = [5, 32], strides = [1, 1]} : vector<5x96xf32> to vector<5x32xf32>
    %cst_28 = arith.constant 2.500000e-01 : f32
    %66 = vector.broadcast %cst_28 : f32 to vector<5x32xf32>
    %67 = arith.mulf %65, %66 : vector<5x32xf32>
    %68 = vector.extract_strided_slice %64 {offsets = [0, 32], sizes = [5, 32], strides = [1, 1]} : vector<5x96xf32> to vector<5x32xf32>
    %69 = vector.extract_strided_slice %64 {offsets = [0, 64], sizes = [5, 32], strides = [1, 1]} : vector<5x96xf32> to vector<5x32xf32>
    %c0_29 = arith.constant 0 : index
    %c0_30 = arith.constant 0 : index
    %c0_31 = arith.constant 0 : index
    %70 = vector.load %arg8[%c0_29, %c0_30, %c0_31] : memref<2x32x32xbf16, #tpu.memory_space<vmem>>, vector<1x32x32xbf16>
    %71 = vector.shape_cast %70 : vector<1x32x32xbf16> to vector<32x32xbf16>
    %c0_32 = arith.constant 0 : index
    %c0_33 = arith.constant 0 : index
    %c0_34 = arith.constant 0 : index
    %72 = vector.load %arg9[%c0_32, %c0_33, %c0_34] : memref<2x1x32xf32, #tpu.memory_space<vmem>>, vector<1x1x32xf32>
    %73 = vector.shape_cast %72 : vector<1x1x32xf32> to vector<1x32xf32>
    %74 = vector.extract_strided_slice %67 {offsets = [0, 0], sizes = [5, 16], strides = [1, 1]} : vector<5x32xf32> to vector<5x16xf32>
    %75 = vector.extract_strided_slice %68 {offsets = [0, 0], sizes = [5, 16], strides = [1, 1]} : vector<5x32xf32> to vector<5x16xf32>
    %76 = arith.truncf %74 : vector<5x16xf32> to vector<5x16xbf16>
    %77 = arith.truncf %75 : vector<5x16xf32> to vector<5x16xbf16>
    %cst_35 = arith.constant dense<0.000000e+00> : vector<5x5xf32>
    %78 = tpu.matmul %76, %77, %cst_35 {dimension_numbers = #tpu.dot_dimension_numbers<[1], [1], [0], [0], [0, 0, 1, 0], [], []>} : vector<5x16xbf16>, vector<5x16xbf16>, vector<5x5xf32> -> vector<5x5xf32>
    %cst_36 = arith.constant dense<0xFF800000> : vector<5xf32>
    %79 = vector.multi_reduction <maximumf>, %78, %cst_36 [1] : vector<5x5xf32> to vector<5xf32>
    %80 = vector.shape_cast %79 : vector<5xf32> to vector<5x1xf32>
    %81 = vector.broadcast %80 : vector<5x1xf32> to vector<5x5xf32>
    %82 = arith.subf %78, %81 : vector<5x5xf32>
    %83 = math.exp %82 : vector<5x5xf32>
    %cst_37 = arith.constant dense<0.000000e+00> : vector<5xf32>
    %84 = vector.multi_reduction <add>, %83, %cst_37 [1] : vector<5x5xf32> to vector<5xf32>
    %85 = vector.shape_cast %84 : vector<5xf32> to vector<5x1xf32>
    %86 = tpu.reciprocal %85 {approx = true} : vector<5x1xf32> -> vector<5x1xf32>
    %87 = vector.broadcast %86 : vector<5x1xf32> to vector<5x5xf32>
    %88 = arith.mulf %83, %87 : vector<5x5xf32>
    %89 = vector.extract_strided_slice %69 {offsets = [0, 0], sizes = [5, 16], strides = [1, 1]} : vector<5x32xf32> to vector<5x16xf32>
    %90 = arith.truncf %88 : vector<5x5xf32> to vector<5x5xbf16>
    %91 = arith.truncf %89 : vector<5x16xf32> to vector<5x16xbf16>
    %cst_38 = arith.constant dense<0.000000e+00> : vector<5x16xf32>
    %92 = tpu.matmul %90, %91, %cst_38 {dimension_numbers = #tpu.dot_dimension_numbers<[1], [0], [0], [1], [0, 0, 1, 1], [], []>} : vector<5x5xbf16>, vector<5x16xbf16>, vector<5x16xf32> -> vector<5x16xf32>
    %93 = vector.extract_strided_slice %71 {offsets = [0, 0], sizes = [16, 32], strides = [1, 1]} : vector<32x32xbf16> to vector<16x32xbf16>
    %94 = arith.truncf %92 : vector<5x16xf32> to vector<5x16xbf16>
    %cst_39 = arith.constant dense<0.000000e+00> : vector<5x32xf32>
    %95 = tpu.matmul %94, %93, %cst_39 {dimension_numbers = #tpu.dot_dimension_numbers<[1], [0], [0], [1], [0, 0, 1, 1], [], []>} : vector<5x16xbf16>, vector<16x32xbf16>, vector<5x32xf32> -> vector<5x32xf32>
    %96 = vector.broadcast %73 : vector<1x32xf32> to vector<5x32xf32>
    %97 = arith.addf %96, %95 : vector<5x32xf32>
    %98 = vector.extract_strided_slice %67 {offsets = [0, 16], sizes = [5, 16], strides = [1, 1]} : vector<5x32xf32> to vector<5x16xf32>
    %99 = vector.extract_strided_slice %68 {offsets = [0, 16], sizes = [5, 16], strides = [1, 1]} : vector<5x32xf32> to vector<5x16xf32>
    %100 = arith.truncf %98 : vector<5x16xf32> to vector<5x16xbf16>
    %101 = arith.truncf %99 : vector<5x16xf32> to vector<5x16xbf16>
    %cst_40 = arith.constant dense<0.000000e+00> : vector<5x5xf32>
    %102 = tpu.matmul %100, %101, %cst_40 {dimension_numbers = #tpu.dot_dimension_numbers<[1], [1], [0], [0], [0, 0, 1, 0], [], []>} : vector<5x16xbf16>, vector<5x16xbf16>, vector<5x5xf32> -> vector<5x5xf32>
    %cst_41 = arith.constant dense<0xFF800000> : vector<5xf32>
    %103 = vector.multi_reduction <maximumf>, %102, %cst_41 [1] : vector<5x5xf32> to vector<5xf32>
    %104 = vector.shape_cast %103 : vector<5xf32> to vector<5x1xf32>
    %105 = vector.broadcast %104 : vector<5x1xf32> to vector<5x5xf32>
    %106 = arith.subf %102, %105 : vector<5x5xf32>
    %107 = math.exp %106 : vector<5x5xf32>
    %cst_42 = arith.constant dense<0.000000e+00> : vector<5xf32>
    %108 = vector.multi_reduction <add>, %107, %cst_42 [1] : vector<5x5xf32> to vector<5xf32>
    %109 = vector.shape_cast %108 : vector<5xf32> to vector<5x1xf32>
    %110 = tpu.reciprocal %109 {approx = true} : vector<5x1xf32> -> vector<5x1xf32>
    %111 = vector.broadcast %110 : vector<5x1xf32> to vector<5x5xf32>
    %112 = arith.mulf %107, %111 : vector<5x5xf32>
    %113 = vector.extract_strided_slice %69 {offsets = [0, 16], sizes = [5, 16], strides = [1, 1]} : vector<5x32xf32> to vector<5x16xf32>
    %114 = arith.truncf %112 : vector<5x5xf32> to vector<5x5xbf16>
    %115 = arith.truncf %113 : vector<5x16xf32> to vector<5x16xbf16>
    %cst_43 = arith.constant dense<0.000000e+00> : vector<5x16xf32>
    %116 = tpu.matmul %114, %115, %cst_43 {dimension_numbers = #tpu.dot_dimension_numbers<[1], [0], [0], [1], [0, 0, 1, 1], [], []>} : vector<5x5xbf16>, vector<5x16xbf16>, vector<5x16xf32> -> vector<5x16xf32>
    %117 = vector.extract_strided_slice %71 {offsets = [16, 0], sizes = [16, 32], strides = [1, 1]} : vector<32x32xbf16> to vector<16x32xbf16>
    %118 = arith.truncf %116 : vector<5x16xf32> to vector<5x16xbf16>
    %cst_44 = arith.constant dense<0.000000e+00> : vector<5x32xf32>
    %119 = tpu.matmul %118, %117, %cst_44 {dimension_numbers = #tpu.dot_dimension_numbers<[1], [0], [0], [1], [0, 0, 1, 1], [], []>} : vector<5x16xbf16>, vector<16x32xbf16>, vector<5x32xf32> -> vector<5x32xf32>
    %120 = arith.addf %97, %119 : vector<5x32xf32>
    %121 = arith.addf %30, %120 : vector<5x32xf32>
    %c0_45 = arith.constant 0 : index
    %c0_46 = arith.constant 0 : index
    %c0_47 = arith.constant 0 : index
    %122 = vector.load %arg10[%c0_45, %c0_46, %c0_47] : memref<2x2x32xf32, #tpu.memory_space<vmem>>, vector<1x2x32xf32>
    %123 = vector.shape_cast %122 : vector<1x2x32xf32> to vector<2x32xf32>
    %124 = vector.extract_strided_slice %123 {offsets = [0, 0], sizes = [1, 32], strides = [1, 1]} : vector<2x32xf32> to vector<1x32xf32>
    %125 = vector.extract_strided_slice %123 {offsets = [1, 0], sizes = [1, 32], strides = [1, 1]} : vector<2x32xf32> to vector<1x32xf32>
    %cst_48 = arith.constant dense<0.000000e+00> : vector<5xf32>
    %126 = vector.multi_reduction <add>, %121, %cst_48 [1] : vector<5x32xf32> to vector<5xf32>
    %127 = vector.shape_cast %126 : vector<5xf32> to vector<5x1xf32>
    %cst_49 = arith.constant 3.200000e+01 : f32
    %128 = vector.broadcast %cst_49 : f32 to vector<5x1xf32>
    %129 = arith.divf %127, %128 : vector<5x1xf32>
    %130 = vector.broadcast %129 : vector<5x1xf32> to vector<5x32xf32>
    %131 = arith.subf %121, %130 : vector<5x32xf32>
    %132 = arith.mulf %131, %131 : vector<5x32xf32>
    %cst_50 = arith.constant dense<0.000000e+00> : vector<5xf32>
    %133 = vector.multi_reduction <add>, %132, %cst_50 [1] : vector<5x32xf32> to vector<5xf32>
    %134 = vector.shape_cast %133 : vector<5xf32> to vector<5x1xf32>
    %cst_51 = arith.constant 3.200000e+01 : f32
    %135 = vector.broadcast %cst_51 : f32 to vector<5x1xf32>
    %136 = arith.divf %134, %135 : vector<5x1xf32>
    %137 = vector.broadcast %129 : vector<5x1xf32> to vector<5x32xf32>
    %138 = arith.subf %121, %137 : vector<5x32xf32>
    %cst_52 = arith.constant 9.99999974E-6 : f32
    %139 = vector.broadcast %cst_52 : f32 to vector<5x1xf32>
    %140 = arith.addf %136, %139 : vector<5x1xf32>
    %141 = math.rsqrt %140 : vector<5x1xf32>
    %142 = vector.broadcast %141 : vector<5x1xf32> to vector<5x32xf32>
    %143 = arith.mulf %138, %142 : vector<5x32xf32>
    %144 = vector.broadcast %124 : vector<1x32xf32> to vector<5x32xf32>
    %145 = arith.mulf %143, %144 : vector<5x32xf32>
    %146 = vector.broadcast %125 : vector<1x32xf32> to vector<5x32xf32>
    %147 = arith.addf %145, %146 : vector<5x32xf32>
    %c0_53 = arith.constant 0 : index
    %c0_54 = arith.constant 0 : index
    %c0_55 = arith.constant 0 : index
    %148 = vector.load %arg11[%c0_53, %c0_54, %c0_55] : memref<2x32x64xbf16, #tpu.memory_space<vmem>>, vector<1x32x64xbf16>
    %149 = vector.shape_cast %148 : vector<1x32x64xbf16> to vector<32x64xbf16>
    %150 = arith.truncf %147 : vector<5x32xf32> to vector<5x32xbf16>
    %cst_56 = arith.constant dense<0.000000e+00> : vector<5x64xf32>
    %151 = tpu.matmul %150, %149, %cst_56 {dimension_numbers = #tpu.dot_dimension_numbers<[1], [0], [0], [1], [0, 0, 1, 1], [], []>} : vector<5x32xbf16>, vector<32x64xbf16>, vector<5x64xf32> -> vector<5x64xf32>
    %c0_57 = arith.constant 0 : index
    %c0_58 = arith.constant 0 : index
    %c0_59 = arith.constant 0 : index
    %152 = vector.load %arg12[%c0_57, %c0_58, %c0_59] : memref<2x1x64xf32, #tpu.memory_space<vmem>>, vector<1x1x64xf32>
    %153 = vector.shape_cast %152 : vector<1x1x64xf32> to vector<1x64xf32>
    %154 = vector.broadcast %153 : vector<1x64xf32> to vector<5x64xf32>
    %155 = arith.addf %151, %154 : vector<5x64xf32>
    %cst_60 = arith.constant 1.702000e+00 : f32
    %156 = vector.broadcast %cst_60 : f32 to vector<5x64xf32>
    %157 = arith.mulf %156, %155 : vector<5x64xf32>
    %158 = arith.negf %157 : vector<5x64xf32>
    %159 = math.exp %158 : vector<5x64xf32>
    %cst_61 = arith.constant 1.000000e+00 : f32
    %160 = vector.broadcast %cst_61 : f32 to vector<5x64xf32>
    %161 = arith.addf %160, %159 : vector<5x64xf32>
    %162 = arith.divf %160, %161 : vector<5x64xf32>
    %163 = arith.mulf %155, %162 : vector<5x64xf32>
    %c0_62 = arith.constant 0 : index
    %c0_63 = arith.constant 0 : index
    %c0_64 = arith.constant 0 : index
    %164 = vector.load %arg13[%c0_62, %c0_63, %c0_64] : memref<2x64x32xbf16, #tpu.memory_space<vmem>>, vector<1x64x32xbf16>
    %165 = vector.shape_cast %164 : vector<1x64x32xbf16> to vector<64x32xbf16>
    %166 = arith.truncf %163 : vector<5x64xf32> to vector<5x64xbf16>
    %cst_65 = arith.constant dense<0.000000e+00> : vector<5x32xf32>
    %167 = tpu.matmul %166, %165, %cst_65 {dimension_numbers = #tpu.dot_dimension_numbers<[1], [0], [0], [1], [0, 0, 1, 1], [], []>} : vector<5x64xbf16>, vector<64x32xbf16>, vector<5x32xf32> -> vector<5x32xf32>
    %168 = arith.addf %121, %167 : vector<5x32xf32>
    %c0_66 = arith.constant 0 : index
    %c0_67 = arith.constant 0 : index
    %c0_68 = arith.constant 0 : index
    %169 = vector.load %arg14[%c0_66, %c0_67, %c0_68] : memref<2x1x32xf32, #tpu.memory_space<vmem>>, vector<1x1x32xf32>
    %170 = vector.shape_cast %169 : vector<1x1x32xf32> to vector<1x32xf32>
    %171 = vector.broadcast %170 : vector<1x32xf32> to vector<5x32xf32>
    %172 = arith.addf %168, %171 : vector<5x32xf32>
    %c1 = arith.constant 1 : index
    %c0_69 = arith.constant 0 : index
    %c0_70 = arith.constant 0 : index
    %173 = vector.load %arg5[%c1, %c0_69, %c0_70] : memref<2x2x32xf32, #tpu.memory_space<vmem>>, vector<1x2x32xf32>
    %174 = vector.shape_cast %173 : vector<1x2x32xf32> to vector<2x32xf32>
    %175 = vector.extract_strided_slice %174 {offsets = [0, 0], sizes = [1, 32], strides = [1, 1]} : vector<2x32xf32> to vector<1x32xf32>
    %176 = vector.extract_strided_slice %174 {offsets = [1, 0], sizes = [1, 32], strides = [1, 1]} : vector<2x32xf32> to vector<1x32xf32>
    %cst_71 = arith.constant dense<0.000000e+00> : vector<5xf32>
    %177 = vector.multi_reduction <add>, %172, %cst_71 [1] : vector<5x32xf32> to vector<5xf32>
    %178 = vector.shape_cast %177 : vector<5xf32> to vector<5x1xf32>
    %cst_72 = arith.constant 3.200000e+01 : f32
    %179 = vector.broadcast %cst_72 : f32 to vector<5x1xf32>
    %180 = arith.divf %178, %179 : vector<5x1xf32>
    %181 = vector.broadcast %180 : vector<5x1xf32> to vector<5x32xf32>
    %182 = arith.subf %172, %181 : vector<5x32xf32>
    %183 = arith.mulf %182, %182 : vector<5x32xf32>
    %cst_73 = arith.constant dense<0.000000e+00> : vector<5xf32>
    %184 = vector.multi_reduction <add>, %183, %cst_73 [1] : vector<5x32xf32> to vector<5xf32>
    %185 = vector.shape_cast %184 : vector<5xf32> to vector<5x1xf32>
    %cst_74 = arith.constant 3.200000e+01 : f32
    %186 = vector.broadcast %cst_74 : f32 to vector<5x1xf32>
    %187 = arith.divf %185, %186 : vector<5x1xf32>
    %188 = vector.broadcast %180 : vector<5x1xf32> to vector<5x32xf32>
    %189 = arith.subf %172, %188 : vector<5x32xf32>
    %cst_75 = arith.constant 9.99999974E-6 : f32
    %190 = vector.broadcast %cst_75 : f32 to vector<5x1xf32>
    %191 = arith.addf %187, %190 : vector<5x1xf32>
    %192 = math.rsqrt %191 : vector<5x1xf32>
    %193 = vector.broadcast %192 : vector<5x1xf32> to vector<5x32xf32>
    %194 = arith.mulf %189, %193 : vector<5x32xf32>
    %195 = vector.broadcast %175 : vector<1x32xf32> to vector<5x32xf32>
    %196 = arith.mulf %194, %195 : vector<5x32xf32>
    %197 = vector.broadcast %176 : vector<1x32xf32> to vector<5x32xf32>
    %198 = arith.addf %196, %197 : vector<5x32xf32>
    %c1_76 = arith.constant 1 : index
    %c0_77 = arith.constant 0 : index
    %c0_78 = arith.constant 0 : index
    %199 = vector.load %arg6[%c1_76, %c0_77, %c0_78] : memref<2x32x96xbf16, #tpu.memory_space<vmem>>, vector<1x32x96xbf16>
    %200 = vector.shape_cast %199 : vector<1x32x96xbf16> to vector<32x96xbf16>
    %201 = arith.truncf %198 : vector<5x32xf32> to vector<5x32xbf16>
    %cst_79 = arith.constant dense<0.000000e+00> : vector<5x96xf32>
    %202 = tpu.matmul %201, %200, %cst_79 {dimension_numbers = #tpu.dot_dimension_numbers<[1], [0], [0], [1], [0, 0, 1, 1], [], []>} : vector<5x32xbf16>, vector<32x96xbf16>, vector<5x96xf32> -> vector<5x96xf32>
    %c1_80 = arith.constant 1 : index
    %c0_81 = arith.constant 0 : index
    %c0_82 = arith.constant 0 : index
    %203 = vector.load %arg7[%c1_80, %c0_81, %c0_82] : memref<2x1x96xf32, #tpu.memory_space<vmem>>, vector<1x1x96xf32>
    %204 = vector.shape_cast %203 : vector<1x1x96xf32> to vector<1x96xf32>
    %205 = vector.broadcast %204 : vector<1x96xf32> to vector<5x96xf32>
    %206 = arith.addf %202, %205 : vector<5x96xf32>
    %207 = vector.extract_strided_slice %206 {offsets = [0, 0], sizes = [5, 32], strides = [1, 1]} : vector<5x96xf32> to vector<5x32xf32>
    %cst_83 = arith.constant 2.500000e-01 : f32
    %208 = vector.broadcast %cst_83 : f32 to vector<5x32xf32>
    %209 = arith.mulf %207, %208 : vector<5x32xf32>
    %210 = vector.extract_strided_slice %206 {offsets = [0, 32], sizes = [5, 32], strides = [1, 1]} : vector<5x96xf32> to vector<5x32xf32>
    %211 = vector.extract_strided_slice %206 {offsets = [0, 64], sizes = [5, 32], strides = [1, 1]} : vector<5x96xf32> to vector<5x32xf32>
    %c1_84 = arith.constant 1 : index
    %c0_85 = arith.constant 0 : index
    %c0_86 = arith.constant 0 : index
    %212 = vector.load %arg8[%c1_84, %c0_85, %c0_86] : memref<2x32x32xbf16, #tpu.memory_space<vmem>>, vector<1x32x32xbf16>
    %213 = vector.shape_cast %212 : vector<1x32x32xbf16> to vector<32x32xbf16>
    %c1_87 = arith.constant 1 : index
    %c0_88 = arith.constant 0 : index
    %c0_89 = arith.constant 0 : index
    %214 = vector.load %arg9[%c1_87, %c0_88, %c0_89] : memref<2x1x32xf32, #tpu.memory_space<vmem>>, vector<1x1x32xf32>
    %215 = vector.shape_cast %214 : vector<1x1x32xf32> to vector<1x32xf32>
    %216 = vector.extract_strided_slice %209 {offsets = [0, 0], sizes = [5, 16], strides = [1, 1]} : vector<5x32xf32> to vector<5x16xf32>
    %217 = vector.extract_strided_slice %210 {offsets = [0, 0], sizes = [5, 16], strides = [1, 1]} : vector<5x32xf32> to vector<5x16xf32>
    %218 = arith.truncf %216 : vector<5x16xf32> to vector<5x16xbf16>
    %219 = arith.truncf %217 : vector<5x16xf32> to vector<5x16xbf16>
    %cst_90 = arith.constant dense<0.000000e+00> : vector<5x5xf32>
    %220 = tpu.matmul %218, %219, %cst_90 {dimension_numbers = #tpu.dot_dimension_numbers<[1], [1], [0], [0], [0, 0, 1, 0], [], []>} : vector<5x16xbf16>, vector<5x16xbf16>, vector<5x5xf32> -> vector<5x5xf32>
    %cst_91 = arith.constant dense<0xFF800000> : vector<5xf32>
    %221 = vector.multi_reduction <maximumf>, %220, %cst_91 [1] : vector<5x5xf32> to vector<5xf32>
    %222 = vector.shape_cast %221 : vector<5xf32> to vector<5x1xf32>
    %223 = vector.broadcast %222 : vector<5x1xf32> to vector<5x5xf32>
    %224 = arith.subf %220, %223 : vector<5x5xf32>
    %225 = math.exp %224 : vector<5x5xf32>
    %cst_92 = arith.constant dense<0.000000e+00> : vector<5xf32>
    %226 = vector.multi_reduction <add>, %225, %cst_92 [1] : vector<5x5xf32> to vector<5xf32>
    %227 = vector.shape_cast %226 : vector<5xf32> to vector<5x1xf32>
    %228 = tpu.reciprocal %227 {approx = true} : vector<5x1xf32> -> vector<5x1xf32>
    %229 = vector.broadcast %228 : vector<5x1xf32> to vector<5x5xf32>
    %230 = arith.mulf %225, %229 : vector<5x5xf32>
    %231 = vector.extract_strided_slice %211 {offsets = [0, 0], sizes = [5, 16], strides = [1, 1]} : vector<5x32xf32> to vector<5x16xf32>
    %232 = arith.truncf %230 : vector<5x5xf32> to vector<5x5xbf16>
    %233 = arith.truncf %231 : vector<5x16xf32> to vector<5x16xbf16>
    %cst_93 = arith.constant dense<0.000000e+00> : vector<5x16xf32>
    %234 = tpu.matmul %232, %233, %cst_93 {dimension_numbers = #tpu.dot_dimension_numbers<[1], [0], [0], [1], [0, 0, 1, 1], [], []>} : vector<5x5xbf16>, vector<5x16xbf16>, vector<5x16xf32> -> vector<5x16xf32>
    %235 = vector.extract_strided_slice %213 {offsets = [0, 0], sizes = [16, 32], strides = [1, 1]} : vector<32x32xbf16> to vector<16x32xbf16>
    %236 = arith.truncf %234 : vector<5x16xf32> to vector<5x16xbf16>
    %cst_94 = arith.constant dense<0.000000e+00> : vector<5x32xf32>
    %237 = tpu.matmul %236, %235, %cst_94 {dimension_numbers = #tpu.dot_dimension_numbers<[1], [0], [0], [1], [0, 0, 1, 1], [], []>} : vector<5x16xbf16>, vector<16x32xbf16>, vector<5x32xf32> -> vector<5x32xf32>
    %238 = vector.broadcast %215 : vector<1x32xf32> to vector<5x32xf32>
    %239 = arith.addf %238, %237 : vector<5x32xf32>
    %240 = vector.extract_strided_slice %209 {offsets = [0, 16], sizes = [5, 16], strides = [1, 1]} : vector<5x32xf32> to vector<5x16xf32>
    %241 = vector.extract_strided_slice %210 {offsets = [0, 16], sizes = [5, 16], strides = [1, 1]} : vector<5x32xf32> to vector<5x16xf32>
    %242 = arith.truncf %240 : vector<5x16xf32> to vector<5x16xbf16>
    %243 = arith.truncf %241 : vector<5x16xf32> to vector<5x16xbf16>
    %cst_95 = arith.constant dense<0.000000e+00> : vector<5x5xf32>
    %244 = tpu.matmul %242, %243, %cst_95 {dimension_numbers = #tpu.dot_dimension_numbers<[1], [1], [0], [0], [0, 0, 1, 0], [], []>} : vector<5x16xbf16>, vector<5x16xbf16>, vector<5x5xf32> -> vector<5x5xf32>
    %cst_96 = arith.constant dense<0xFF800000> : vector<5xf32>
    %245 = vector.multi_reduction <maximumf>, %244, %cst_96 [1] : vector<5x5xf32> to vector<5xf32>
    %246 = vector.shape_cast %245 : vector<5xf32> to vector<5x1xf32>
    %247 = vector.broadcast %246 : vector<5x1xf32> to vector<5x5xf32>
    %248 = arith.subf %244, %247 : vector<5x5xf32>
    %249 = math.exp %248 : vector<5x5xf32>
    %cst_97 = arith.constant dense<0.000000e+00> : vector<5xf32>
    %250 = vector.multi_reduction <add>, %249, %cst_97 [1] : vector<5x5xf32> to vector<5xf32>
    %251 = vector.shape_cast %250 : vector<5xf32> to vector<5x1xf32>
    %252 = tpu.reciprocal %251 {approx = true} : vector<5x1xf32> -> vector<5x1xf32>
    %253 = vector.broadcast %252 : vector<5x1xf32> to vector<5x5xf32>
    %254 = arith.mulf %249, %253 : vector<5x5xf32>
    %255 = vector.extract_strided_slice %211 {offsets = [0, 16], sizes = [5, 16], strides = [1, 1]} : vector<5x32xf32> to vector<5x16xf32>
    %256 = arith.truncf %254 : vector<5x5xf32> to vector<5x5xbf16>
    %257 = arith.truncf %255 : vector<5x16xf32> to vector<5x16xbf16>
    %cst_98 = arith.constant dense<0.000000e+00> : vector<5x16xf32>
    %258 = tpu.matmul %256, %257, %cst_98 {dimension_numbers = #tpu.dot_dimension_numbers<[1], [0], [0], [1], [0, 0, 1, 1], [], []>} : vector<5x5xbf16>, vector<5x16xbf16>, vector<5x16xf32> -> vector<5x16xf32>
    %259 = vector.extract_strided_slice %213 {offsets = [16, 0], sizes = [16, 32], strides = [1, 1]} : vector<32x32xbf16> to vector<16x32xbf16>
    %260 = arith.truncf %258 : vector<5x16xf32> to vector<5x16xbf16>
    %cst_99 = arith.constant dense<0.000000e+00> : vector<5x32xf32>
    %261 = tpu.matmul %260, %259, %cst_99 {dimension_numbers = #tpu.dot_dimension_numbers<[1], [0], [0], [1], [0, 0, 1, 1], [], []>} : vector<5x16xbf16>, vector<16x32xbf16>, vector<5x32xf32> -> vector<5x32xf32>
    %262 = arith.addf %239, %261 : vector<5x32xf32>
    %263 = arith.addf %172, %262 : vector<5x32xf32>
    %c1_100 = arith.constant 1 : index
    %c0_101 = arith.constant 0 : index
    %c0_102 = arith.constant 0 : index
    %264 = vector.load %arg10[%c1_100, %c0_101, %c0_102] : memref<2x2x32xf32, #tpu.memory_space<vmem>>, vector<1x2x32xf32>
    %265 = vector.shape_cast %264 : vector<1x2x32xf32> to vector<2x32xf32>
    %266 = vector.extract_strided_slice %265 {offsets = [0, 0], sizes = [1, 32], strides = [1, 1]} : vector<2x32xf32> to vector<1x32xf32>
    %267 = vector.extract_strided_slice %265 {offsets = [1, 0], sizes = [1, 32], strides = [1, 1]} : vector<2x32xf32> to vector<1x32xf32>
    %cst_103 = arith.constant dense<0.000000e+00> : vector<5xf32>
    %268 = vector.multi_reduction <add>, %263, %cst_103 [1] : vector<5x32xf32> to vector<5xf32>
    %269 = vector.shape_cast %268 : vector<5xf32> to vector<5x1xf32>
    %cst_104 = arith.constant 3.200000e+01 : f32
    %270 = vector.broadcast %cst_104 : f32 to vector<5x1xf32>
    %271 = arith.divf %269, %270 : vector<5x1xf32>
    %272 = vector.broadcast %271 : vector<5x1xf32> to vector<5x32xf32>
    %273 = arith.subf %263, %272 : vector<5x32xf32>
    %274 = arith.mulf %273, %273 : vector<5x32xf32>
    %cst_105 = arith.constant dense<0.000000e+00> : vector<5xf32>
    %275 = vector.multi_reduction <add>, %274, %cst_105 [1] : vector<5x32xf32> to vector<5xf32>
    %276 = vector.shape_cast %275 : vector<5xf32> to vector<5x1xf32>
    %cst_106 = arith.constant 3.200000e+01 : f32
    %277 = vector.broadcast %cst_106 : f32 to vector<5x1xf32>
    %278 = arith.divf %276, %277 : vector<5x1xf32>
    %279 = vector.broadcast %271 : vector<5x1xf32> to vector<5x32xf32>
    %280 = arith.subf %263, %279 : vector<5x32xf32>
    %cst_107 = arith.constant 9.99999974E-6 : f32
    %281 = vector.broadcast %cst_107 : f32 to vector<5x1xf32>
    %282 = arith.addf %278, %281 : vector<5x1xf32>
    %283 = math.rsqrt %282 : vector<5x1xf32>
    %284 = vector.broadcast %283 : vector<5x1xf32> to vector<5x32xf32>
    %285 = arith.mulf %280, %284 : vector<5x32xf32>
    %286 = vector.broadcast %266 : vector<1x32xf32> to vector<5x32xf32>
    %287 = arith.mulf %285, %286 : vector<5x32xf32>
    %288 = vector.broadcast %267 : vector<1x32xf32> to vector<5x32xf32>
    %289 = arith.addf %287, %288 : vector<5x32xf32>
    %c1_108 = arith.constant 1 : index
    %c0_109 = arith.constant 0 : index
    %c0_110 = arith.constant 0 : index
    %290 = vector.load %arg11[%c1_108, %c0_109, %c0_110] : memref<2x32x64xbf16, #tpu.memory_space<vmem>>, vector<1x32x64xbf16>
    %291 = vector.shape_cast %290 : vector<1x32x64xbf16> to vector<32x64xbf16>
    %292 = arith.truncf %289 : vector<5x32xf32> to vector<5x32xbf16>
    %cst_111 = arith.constant dense<0.000000e+00> : vector<5x64xf32>
    %293 = tpu.matmul %292, %291, %cst_111 {dimension_numbers = #tpu.dot_dimension_numbers<[1], [0], [0], [1], [0, 0, 1, 1], [], []>} : vector<5x32xbf16>, vector<32x64xbf16>, vector<5x64xf32> -> vector<5x64xf32>
    %c1_112 = arith.constant 1 : index
    %c0_113 = arith.constant 0 : index
    %c0_114 = arith.constant 0 : index
    %294 = vector.load %arg12[%c1_112, %c0_113, %c0_114] : memref<2x1x64xf32, #tpu.memory_space<vmem>>, vector<1x1x64xf32>
    %295 = vector.shape_cast %294 : vector<1x1x64xf32> to vector<1x64xf32>
    %296 = vector.broadcast %295 : vector<1x64xf32> to vector<5x64xf32>
    %297 = arith.addf %293, %296 : vector<5x64xf32>
    %cst_115 = arith.constant 1.702000e+00 : f32
    %298 = vector.broadcast %cst_115 : f32 to vector<5x64xf32>
    %299 = arith.mulf %298, %297 : vector<5x64xf32>
    %300 = arith.negf %299 : vector<5x64xf32>
    %301 = math.exp %300 : vector<5x64xf32>
    %cst_116 = arith.constant 1.000000e+00 : f32
    %302 = vector.broadcast %cst_116 : f32 to vector<5x64xf32>
    %303 = arith.addf %302, %301 : vector<5x64xf32>
    %304 = arith.divf %302, %303 : vector<5x64xf32>
    %305 = arith.mulf %297, %304 : vector<5x64xf32>
    %c1_117 = arith.constant 1 : index
    %c0_118 = arith.constant 0 : index
    %c0_119 = arith.constant 0 : index
    %306 = vector.load %arg13[%c1_117, %c0_118, %c0_119] : memref<2x64x32xbf16, #tpu.memory_space<vmem>>, vector<1x64x32xbf16>
    %307 = vector.shape_cast %306 : vector<1x64x32xbf16> to vector<64x32xbf16>
    %308 = arith.truncf %305 : vector<5x64xf32> to vector<5x64xbf16>
    %cst_120 = arith.constant dense<0.000000e+00> : vector<5x32xf32>
    %309 = tpu.matmul %308, %307, %cst_120 {dimension_numbers = #tpu.dot_dimension_numbers<[1], [0], [0], [1], [0, 0, 1, 1], [], []>} : vector<5x64xbf16>, vector<64x32xbf16>, vector<5x32xf32> -> vector<5x32xf32>
    %310 = arith.addf %263, %309 : vector<5x32xf32>
    %c1_121 = arith.constant 1 : index
    %c0_122 = arith.constant 0 : index
    %c0_123 = arith.constant 0 : index
    %311 = vector.load %arg14[%c1_121, %c0_122, %c0_123] : memref<2x1x32xf32, #tpu.memory_space<vmem>>, vector<1x1x32xf32>
    %312 = vector.shape_cast %311 : vector<1x1x32xf32> to vector<1x32xf32>
    %313 = vector.broadcast %312 : vector<1x32xf32> to vector<5x32xf32>
    %314 = arith.addf %310, %313 : vector<5x32xf32>
    %c0_124 = arith.constant 0 : index
    %c0_125 = arith.constant 0 : index
    %315 = vector.load %arg15[%c0_124, %c0_125] : memref<2x32xf32, #tpu.memory_space<vmem>>, vector<2x32xf32>
    %316 = vector.extract_strided_slice %315 {offsets = [0, 0], sizes = [1, 32], strides = [1, 1]} : vector<2x32xf32> to vector<1x32xf32>
    %317 = vector.extract_strided_slice %315 {offsets = [1, 0], sizes = [1, 32], strides = [1, 1]} : vector<2x32xf32> to vector<1x32xf32>
    %cst_126 = arith.constant dense<0.000000e+00> : vector<5xf32>
    %318 = vector.multi_reduction <add>, %314, %cst_126 [1] : vector<5x32xf32> to vector<5xf32>
    %319 = vector.shape_cast %318 : vector<5xf32> to vector<5x1xf32>
    %cst_127 = arith.constant 3.200000e+01 : f32
    %320 = vector.broadcast %cst_127 : f32 to vector<5x1xf32>
    %321 = arith.divf %319, %320 : vector<5x1xf32>
    %322 = vector.broadcast %321 : vector<5x1xf32> to vector<5x32xf32>
    %323 = arith.subf %314, %322 : vector<5x32xf32>
    %324 = arith.mulf %323, %323 : vector<5x32xf32>
    %cst_128 = arith.constant dense<0.000000e+00> : vector<5xf32>
    %325 = vector.multi_reduction <add>, %324, %cst_128 [1] : vector<5x32xf32> to vector<5xf32>
    %326 = vector.shape_cast %325 : vector<5xf32> to vector<5x1xf32>
    %cst_129 = arith.constant 3.200000e+01 : f32
    %327 = vector.broadcast %cst_129 : f32 to vector<5x1xf32>
    %328 = arith.divf %326, %327 : vector<5x1xf32>
    %329 = vector.broadcast %321 : vector<5x1xf32> to vector<5x32xf32>
    %330 = arith.subf %314, %329 : vector<5x32xf32>
    %cst_130 = arith.constant 9.99999974E-6 : f32
    %331 = vector.broadcast %cst_130 : f32 to vector<5x1xf32>
    %332 = arith.addf %328, %331 : vector<5x1xf32>
    %333 = math.rsqrt %332 : vector<5x1xf32>
    %334 = vector.broadcast %333 : vector<5x1xf32> to vector<5x32xf32>
    %335 = arith.mulf %330, %334 : vector<5x32xf32>
    %336 = vector.broadcast %316 : vector<1x32xf32> to vector<5x32xf32>
    %337 = arith.mulf %335, %336 : vector<5x32xf32>
    %338 = vector.broadcast %317 : vector<1x32xf32> to vector<5x32xf32>
    %339 = arith.addf %337, %338 : vector<5x32xf32>
    %c0_131 = arith.constant 0 : index
    %c0_132 = arith.constant 0 : index
    %340 = vector.load %arg16[%c0_131, %c0_132] : memref<32x16xbf16, #tpu.memory_space<vmem>>, vector<32x16xbf16>
    %341 = arith.truncf %339 : vector<5x32xf32> to vector<5x32xbf16>
    %cst_133 = arith.constant dense<0.000000e+00> : vector<5x16xf32>
    %342 = tpu.matmul %341, %340, %cst_133 {dimension_numbers = #tpu.dot_dimension_numbers<[1], [0], [0], [1], [0, 0, 1, 1], [], []>} : vector<5x32xbf16>, vector<32x16xbf16>, vector<5x16xf32> -> vector<5x16xf32>
    %343 = vector.extract_strided_slice %342 {offsets = [0, 0], sizes = [1, 16], strides = [1, 1]} : vector<5x16xf32> to vector<1x16xf32>
    %344 = vector.shape_cast %343 : vector<1x16xf32> to vector<1x1x16xf32>
    %c0_134 = arith.constant 0 : index
    %c0_135 = arith.constant 0 : index
    %c0_136 = arith.constant 0 : index
    %345 = vector.load %arg17[%c0_134, %c0_135, %c0_136] : memref<1x1x16xf32, #tpu.memory_space<vmem>>, vector<1x1x16xf32>
    tpu.vector_store %arg17[%c0_134, %c0_135, %c0_136], %344 {strides = array<i32>} : memref<1x1x16xf32, #tpu.memory_space<vmem>>, vector<1x1x16xf32>,
    return
  }
  func.func @transform_0(%arg0: i32) -> (i32, i32, i32) {
    %c0_i32 = arith.constant 0 : i32
    %c0_i32_0 = arith.constant 0 : i32
    %c0_i32_1 = arith.constant 0 : i32
    return %arg0, %c0_i32, %c0_i32_0 : i32, i32, i32
  }
  func.func @transform_1(%arg0: i32) -> (i32, i32) {
    %c0_i32 = arith.constant 0 : i32
    %c0_i32_0 = arith.constant 0 : i32
    %c0_i32_1 = arith.constant 0 : i32
    return %c0_i32, %c0_i32_0 : i32, i32
  }
  func.func @transform_2(%arg0: i32) -> (i32, i32) {
    %c0_i32 = arith.constant 0 : i32
    %c0_i32_0 = arith.constant 0 : i32
    %c0_i32_1 = arith.constant 0 : i32
    return %c0_i32, %c0_i32_0 : i32, i32
  }
  func.func @transform_3(%arg0: i32) -> (i32, i32) {
    %c0_i32 = arith.constant 0 : i32
    %c0_i32_0 = arith.constant 0 : i32
    %c0_i32_1 = arith.constant 0 : i32
    return %c0_i32, %c0_i32_0 : i32, i32
  }
  func.func @transform_4(%arg0: i32) -> (i32, i32, i32) {
    %c0_i32 = arith.constant 0 : i32
    %c0_i32_0 = arith.constant 0 : i32
    %c0_i32_1 = arith.constant 0 : i32
    %c0_i32_2 = arith.constant 0 : i32
    return %c0_i32, %c0_i32_0, %c0_i32_1 : i32, i32, i32
  }
  func.func @transform_5(%arg0: i32) -> (i32, i32, i32) {
    %c0_i32 = arith.constant 0 : i32
    %c0_i32_0 = arith.constant 0 : i32
    %c0_i32_1 = arith.constant 0 : i32
    %c0_i32_2 = arith.constant 0 : i32
    return %c0_i32, %c0_i32_0, %c0_i32_1 : i32, i32, i32
  }
  func.func @transform_6(%arg0: i32) -> (i32, i32, i32) {
    %c0_i32 = arith.constant 0 : i32
    %c0_i32_0 = arith.constant 0 : i32
    %c0_i32_1 = arith.constant 0 : i32
    %c0_i32_2 = arith.constant 0 : i32
    return %c0_i32, %c0_i32_0, %c0_i32_1 : i32, i32, i32
  }
  func.func @transform_7(%arg0: i32) -> (i32, i32, i32) {
    %c0_i32 = arith.constant 0 : i32
    %c0_i32_0 = arith.constant 0 : i32
    %c0_i32_1 = arith.constant 0 : i32
    %c0_i32_2 = arith.constant 0 : i32
    return %c0_i32, %c0_i32_0, %c0_i32_1 : i32, i32, i32
  }
  func.func @transform_8(%arg0: i32) -> (i32, i32, i32) {
    %c0_i32 = arith.constant 0 : i32
    %c0_i32_0 = arith.constant 0 : i32
    %c0_i32_1 = arith.constant 0 : i32
    %c0_i32_2 = arith.constant 0 : i32
    return %c0_i32, %c0_i32_0, %c0_i32_1 : i32, i32, i32
  }
  func.func @transform_9(%arg0: i32) -> (i32, i32, i32) {
    %c0_i32 = arith.constant 0 : i32
    %c0_i32_0 = arith.constant 0 : i32
    %c0_i32_1 = arith.constant 0 : i32
    %c0_i32_2 = arith.constant 0 : i32
    return %c0_i32, %c0_i32_0, %c0_i32_1 : i32, i32, i32
  }
  func.func @transform_10(%arg0: i32) -> (i32, i32, i32) {
    %c0_i32 = arith.constant 0 : i32
    %c0_i32_0 = arith.constant 0 : i32
    %c0_i32_1 = arith.constant 0 : i32
    %c0_i32_2 = arith.constant 0 : i32
    return %c0_i32, %c0_i32_0, %c0_i32_1 : i32, i32, i32
  }
  func.func @transform_11(%arg0: i32) -> (i32, i32, i32) {
    %c0_i32 = arith.constant 0 : i32
    %c0_i32_0 = arith.constant 0 : i32
    %c0_i32_1 = arith.constant 0 : i32
    %c0_i32_2 = arith.constant 0 : i32
    return %c0_i32, %c0_i32_0, %c0_i32_1 : i32, i32, i32
  }
  func.func @transform_12(%arg0: i32) -> (i32, i32, i32) {
    %c0_i32 = arith.constant 0 : i32
    %c0_i32_0 = arith.constant 0 : i32
    %c0_i32_1 = arith.constant 0 : i32
    %c0_i32_2 = arith.constant 0 : i32
    return %c0_i32, %c0_i32_0, %c0_i32_1 : i32, i32, i32
  }
  func.func @transform_13(%arg0: i32) -> (i32, i32, i32) {
    %c0_i32 = arith.constant 0 : i32
    %c0_i32_0 = arith.constant 0 : i32
    %c0_i32_1 = arith.constant 0 : i32
    %c0_i32_2 = arith.constant 0 : i32
    return %c0_i32, %c0_i32_0, %c0_i32_1 : i32, i32, i32
  }
  func.func @transform_14(%arg0: i32) -> (i32, i32) {
    %c0_i32 = arith.constant 0 : i32
    %c0_i32_0 = arith.constant 0 : i32
    %c0_i32_1 = arith.constant 0 : i32
    return %c0_i32, %c0_i32_0 : i32, i32
  }
  func.func @transform_15(%arg0: i32) -> (i32, i32) {
    %c0_i32 = arith.constant 0 : i32
    %c0_i32_0 = arith.constant 0 : i32
    %c0_i32_1 = arith.constant 0 : i32
    return %c0_i32, %c0_i32_0 : i32, i32
  }
  func.func @transform_16(%arg0: i32) -> (i32, i32, i32) {
    %c0_i32 = arith.constant 0 : i32
    %c0_i32_0 = arith.constant 0 : i32
    %c0_i32_1 = arith.constant 0 : i32
    return %arg0, %c0_i32, %c0_i32_0 : i32, i32, i32
  }
}

</mosaic_0001>

<bundles_post_ra>
// kernel: feature_extractor_forward.1
= control target key start
LH: loop header
LB: loop body
LE: loop exit
PB: predicated region body
PF: predicated region fallthrough
CT: control target
= control target key end

     0   :  { %s3066_s0 = inlined_call_operand.vmem [shape: bf16[4,5,192], index: 0, kind: input, shape index: {}]   ;;  %s3067_s1 = inlined_call_operand.vmem [shape: bf16[192,32], index: 1, kind: input, shape index: {}]   ;;  %s3068_s2 = inlined_call_operand.vmem [shape: f32[5,32], index: 2, kind: input, shape index: {}]   ;;  %s3069_s3 = inlined_call_operand.vmem [shape: f32[2,32], index: 3, kind: input, shape index: {}]   ;;  %s3070_s4 = inlined_call_operand.vmem [shape: f32[2,2,32], index: 4, kind: input, shape index: {}]   ;;  %s3071_s5 = inlined_call_operand.vmem [shape: bf16[2,32,96], index: 5, kind: input, shape index: {}]   ;;  %s3072_s6 = inlined_call_operand.vmem [shape: f32[2,1,96], index: 6, kind: input, shape index: {}]   ;;  %s3073_s7 = inlined_call_operand.vmem [shape: bf16[2,32,32], index: 7, kind: input, shape index: {}]   ;;  %s3074_s8 = inlined_call_operand.vmem [shape: f32[2,1,32], index: 8, kind: input, shape index: {}]   ;;  %s3075_s9 = inlined_call_operand.vmem [shape: f32[2,2,32], index: 9, kind: input, shape index: {}]   ;;  %s3076_s10 = inlined_call_operand.vmem [shape: bf16[2,32,64], index: 10, kind: input, shape index: {}]   ;;  %s3077_s11 = inlined_call_operand.vmem [shape: f32[2,1,64], index: 11, kind: input, shape index: {}]   ;;  %s3078_s12 = inlined_call_operand.vmem [shape: bf16[2,64,32], index: 12, kind: input, shape index: {}]   ;;  %s3079_s13 = inlined_call_operand.vmem [shape: f32[2,1,32], index: 13, kind: input, shape index: {}]   ;;  %s3080_s14 = inlined_call_operand.vmem [shape: f32[2,32], index: 14, kind: input, shape index: {}]   ;;  %s3081_s15 = inlined_call_operand.vmem [shape: bf16[32,16], index: 15, kind: input, shape index: {}]   ;;  %s3082_s16 = inlined_call_operand.hbm [shape: f32[4,1,16], index: 16, kind: output, shape index: {}]  }
   0x1   :  { %3089 = sst [smem:[#allocation11_spill]] %s3066_s0 }
   0x2   :  { %21 = vsyncpa [#allocation3], 0 }
   0x3   :  { %23 = vsyncpa [#allocation3 + $0x1], 0  ;;  %s2654_s21 = smov 0   ;;  %s2656_s22 = smov 0  }
   0x4   :  { %s2658_s23 = smov 0   ;;  %s2660_s24 = smov 0  }
   0x5 LB: > { %3090 = sst [smem:[#allocation5_spill]] %s2545_s21  ;;  %s2675_s25 = sadd.s32 4294967295, %s2557_s24   ;;  %s2557_s24 = sphi %s2660_s24, %s3102_s24   ;;  %s2553_s23 = sphi %s2658_s23, %s3104_s23   ;;  %s2549_s22 = sphi %s2656_s22, %s3106_s22   ;;  %s2545_s21 = sphi %s2654_s21, %s3105_s21  }
   0x6   : > { %3091 = sst [smem:[#allocation6_spill]] %s2553_s23  ;;  %s2090_s26 = sadd.s32 4294967294, %s2557_s24  }
   0x7   : > { %3092 = sst [smem:[#allocation7_spill]] %s2557_s24  ;;  %s2679_s27 = sadd.s32 1, %s2557_s24  }
   0x8   : > { %3093 = sst [smem:[#allocation8_spill]] %s2679_s27  ;;  %s377_s28 = sadd.s32 1, %s2553_s23 }
   0x9   : > { %s374_s29 = ssub.s32 %s2557_s24, %s2679_s27  ;;  %p387_p0 = scmp.ne.s32.totalorder %s2553_s23, %s2549_s22 }
   0xa   : > { %p375_p1 = scmp.eq.s32.totalorder %s374_s29, 0  ;;  %p388_p2 = scmp.eq.s32.totalorder %s2675_s25, 3 }
   0xb   : > { %p393_p3 = scmp.ne.s32.totalorder %s2549_s22, %s2545_s21  ;;  %p394_p4 = scmp.eq.s32.totalorder %s2090_s26, 3 }
   0xc   : > { %s2690_s30 = scalar_select %p375_p1, %s2553_s23, %s377_s28  }
   0xd   : > { %p2692_p5 = por %p388_p2, %p387_p0  ;;  %p2696_p6 = por %p394_p4, %p393_p3 }
   0xe   : > { %3094 = sst [smem:[#allocation9_spill]] %s2690_s30  ;;  %p2093_p7 = scmp.ge.s32.totalorder %s2557_s24, 1 }
   0xf   : > { %s3096_s17 = scalar_select %p2696_p6, 1, 0 }
  0x10   : > { %p465_p8 = scmp.lt.s32.totalorder %s2557_s24, 5 }
  0x11   : > { %3097 = sst [smem:[#allocation10_spill]] %s3096_s17 }
  0x12   : > { %p466_p9 = pnand %p2093_p7, %p465_p8 }
  0x13   : > { %p514_p10 = scmp.lt.s32.totalorder (!%p466_p9), %s2675_s25, 3  ;;  %s3098_s27 = sld [smem:[#allocation11_spill]] (!%p466_p9) }
  0x14   : > { %469 = sbr.rel (%p466_p9) target bundleno = 6859 (0x1acb), region = 84  ;;  %s2562_s21 = smov (!%p466_p9), 96  }
  0x15   : > { %s2564_s24 = smov (!%p466_p9), 64   ;;  %s2567_s18 = smov (!%p466_p9), 48  }
  0x16   : > { %s512_s30 = sand.u32 (!%p466_p9), 1, %s2549_s22  }
  0x19   : > { %v2425_v0 = vld [vmem:[%s3067_s1 + $0x38] sm:$0xff]   ;;  %v2559_v1 = vmov 0   ;;  %v2426_v2 = vld [vmem:[%s3067_s1 + $0x30] sm:$0xff]   ;;  %s515_s28 = scalar_select %p514_p10, %s2675_s25, 3  ;;  %v2427_v3 = vld [vmem:[%s3067_s1 + $0x28] sm:$0xff]   ;;  %vm624_vm0 = vcmask 523264   ;;  %v684_v31 = vlaneseq }
  0x1a   : > { %628 = vmatprep.subr.bf16.mxu0 %v2559_v1  ;;  %v2428_v4 = vld [vmem:[%s3067_s1 + $0x20] sm:$0xff]   ;;  %v2429_v5 = vld [vmem:[%s3067_s1 + $0x18] sm:$0xff]   ;;  %v2430_v8 = vld [vmem:[%s3067_s1 + $0x10] sm:$0xff]   ;;  %vm669_vm1 = vcmask 258048   ;;  %v2560_v49 = vmov 0.0   ;;  %vm2561_vm2 = vmmov 0  }
  0x1b   : > { %629 = vmatpush1.bf16.msra.mxu0 %v2425_v0  ;;  %s2191_s23 = sshll.u32 %s515_s28, 3  ;;  %v2431_v9 = vld [vmem:[%s3067_s1 + $0x8] sm:$0xff]   ;;  %v2432_v10 = vld [vmem:[%s3067_s1] sm:$0xff]   ;;  %v2433_v11 = vld [vmem:[%s3067_s1 + $0x58] sm:$0xff]   ;;  %v685_v32 = vshrl.u32 %v684_v31, 7  ;;  %2241 = vmatprep.subr.bf16.mxu1 %v2560_v49  ;;  %vm742_vm3 = vcmask 261120  }
  0x1c   : > { %630 = vmatprep.subr.bf16.mxu0 %v2559_v1  ;;  %s518_s17 = scalar_lea.vmem %s3098_s27, %s2191_s23  ;;  %v2434_v12 = vld [vmem:[%s3067_s1 + $0x50] sm:$0xff]   ;;  %v2435_v13 = vld [vmem:[%s3067_s1 + $0x48] sm:$0xff]   ;;  %v2436_v14 = vld [vmem:[%s3067_s1 + $0x40] sm:$0xff]   ;;  %2245 = vmatprep.mubr.msk.bf16.mxu1 %vm2561_vm2, %v2560_v49  ;;  %s2563_s23 = smov 80   ;;  %vm797_vm4 = vcmask 130048   ;;  %vm844_vm5 = vcmask 36864  }
  0x1d   : > { %v520_v6 = vld [vmem:[%s518_s17] sm:$0x77]  ;;  %v2749_v33 = vsub.s32 0, %v685_v32  ;;  %v2754_v35 = vsub.s32 1, %v685_v32  ;;  %v2439_v48 = vld [vmem:[%s3071_s5 + $0x8] sm:$0xff]   ;;  %s2565_s27 = smov 112  }
  0x1e   : > { %v2097_v7 = vcombine.high %v520_v6, %v520_v6  ;;  %v2096_v15 = vcombine.low %v520_v6, %v520_v6  ;;  %v545_v16 = vld [vmem:[%s3068_s2] sm:$0x1f]  ;;  %2242 = vmatpush3.bf16.msra.mxu1 %v2439_v48  ;;  %vm863_vm6 = vcmask 1041408   ;;  %vm864_vm7 = vcmask 1042432   ;;  %s2188_s28 = sshll.u32 %s2675_s25, 4  ;;  %s513_s17 = scalar_lea.vmem [#allocation2], %s512_s30 }
  0x1f   : > { %631 = vmatpush1.bf16.msra.mxu0 %v2426_v2  ;;  %v668_v34 = vld [vmem:[%s3069_s3] sm:$0x3]  ;;  %2243 = vmatprep.subr.bf16.mxu1 %v2560_v49  ;;  %vm859_vm8 = vcmask 39936   ;;  %s2035_s29 = sshll.u32 %s513_s17, 4  ;;  %vm2020_vm9 = vcmask 122880   ;;  %s2568_s25 = smov [#allocation2]   ;;  %s3027_s29 = int_to_ptr.vmem [resolvable:$true] %s2035_s29 }
  0x20   : > { %632 = vmatprep.subr.bf16.mxu0 %v2559_v1  ;;  %2110 = vmatprep.mubr.msk.bf16.mxu0 %vm624_vm0, %v2097_v7  ;;  %v687_v36 = vrot.slane %v668_v34, %v2749_v33  ;;  %v692_v39 = vrot.slane %v668_v34, %v2754_v35  ;;  %v2440_v50 = vld [vmem:[%s3071_s5] sm:$0xff]  }
  0x21   : > { %v694_v54 = vld [vmem:[%s3070_s4] sm:$0x3] }
  0x22   : > { %2244 = vmatpush3.bf16.msra.mxu1 %v2440_v50  ;;  %v711_v55 = vrot.slane %v694_v54, %v2749_v33  ;;  %v716_v58 = vrot.slane %v694_v54, %v2754_v35  ;;  %v2111_v62 = vld [vmem:[%s3072_s6] ss:$0 sm:$0xff] }
  0x23   : > { %633 = vmatpush1.bf16.msra.mxu0 %v2427_v3  ;;  %2249 = vmatprep.subr.bf16.mxu1 %v2560_v49 }
  0x24   : > { %634 = vmatprep.subr.bf16.mxu0 %v2559_v1 }
  0x27   : > { %635 = vmatpush1.bf16.msra.mxu0 %v2428_v4 }
  0x28   : > { %636 = vmatprep.subr.bf16.mxu0 %v2559_v1 }
  0x2b   : > { %637 = vmatpush1.bf16.msra.mxu0 %v2429_v5 }
  0x2c   : > { %638 = vmatprep.subr.bf16.mxu0 %v2559_v1 }
  0x2f   : > { %639 = vmatpush1.bf16.msra.mxu0 %v2430_v8 }
  0x30   : > { %640 = vmatprep.subr.bf16.mxu0 %v2559_v1 }
  0x33   : > { %641 = vmatpush1.bf16.msra.mxu0 %v2431_v9 }
  0x34   : > { %642 = vmatprep.subr.bf16.mxu0 %v2559_v1 }
  0x37   : > { %643 = vmatpush1.bf16.msra.mxu0 %v2432_v10 }
  0x38   : > { %652 = vmatprep.subr.bf16.mxu0 %v2559_v1 }
  0x3b   : > { %653 = vmatpush2.bf16.msra.mxu0 %v2433_v11 }
  0x3c   : > { %654 = vmatprep.subr.bf16.mxu0 %v2559_v1 }
  0x3f   : > { %655 = vmatpush2.bf16.msra.mxu0 %v2434_v12 }
  0x40   : > { %656 = vmatprep.subr.bf16.mxu0 %v2559_v1 }
  0x43   : > { %657 = vmatpush2.bf16.msra.mxu0 %v2435_v13 }
  0x44   : > { %658 = vmatprep.subr.bf16.mxu0 %v2559_v1 }
  0x47   : > { %659 = vmatpush2.bf16.msra.mxu0 %v2436_v14 }
  0x48   : > { %2279 = vmatprep.subr.bf16.mxu0 %v2560_v49 }
  0x4a   : > { %661 = vmatmul.mubr.bf16.vlgmr.msra.gmra.mxu0 %v2096_v15 }
  0x4b   : > { %2281 = vmatprep.mubr.msk.bf16.mxu0 %vm2561_vm2, %v2560_v49 }
 0x10a   : > { %v662_v17 = vpop.f32.mrf.mxu0 }
 0x10b   : > { %v663_v18 = vadd.f32 %v662_v17, %v545_v16 }
 0x10c   : > { %v664_v19 = vpop.f32.mrf.mxu0 }
 0x10d   : > { %v670_v20 = vsel %vm669_vm1, %v663_v18, 0.0  ;;  %v2566_v19 = vmov 65535  }
 0x10e   : > { %v665_v21 = vpop.f32.mrf.mxu0  ;;  %671 = vadd.xlane.f32.xlu0 %v670_v20  ;;  %v865_v20 = vsel %vm863_vm6, 4294967295, %v2566_v19 }
 0x110   : > { %v666_v22 = vpop.f32.mrf.mxu0 }
 0x111   : > { %v2805_v22 = vsel %vm864_vm7, %v865_v20, 0 }
 0x197   : > { %v672_v23 = vpop.xlane.xlu0 %671 }
 0x198   : > { %v674_v24 = vmul.f32 0.03125, %v672_v23 }
 0x19a   : > { %v675_v25 = vsub.f32 %v663_v18, %v674_v24 }
 0x19c   : > { %v676_v26 = vmul.f32 %v675_v25, %v675_v25 }
 0x19e   : > { %v677_v27 = vsel %vm669_vm1, %v676_v26, 0.0 }
 0x19f   : > { %678 = vadd.xlane.f32.xlu0 %v677_v27  ;;  %v2441_v27 = vld [vmem:[%s3073_s7] sm:$0xff]  }
 0x228   : > { %v679_v28 = vpop.xlane.xlu0 %678 }
 0x229   : > { %v680_v29 = vmul.f32 0.03125, %v679_v28 }
 0x22b   : > { %v681_v30 = vadd.f32 1e-05, %v680_v29 }
 0x22d   : > { %2461 = vrsqrt.f32 %v681_v30 }
 0x23a   : > { %v2462_v37 = vpop.eup %2461 }
 0x23b   : > { %v683_v38 = vmul.f32 %v2462_v37, %v675_v25 }
 0x23d   : > { %v688_v40 = vmul.f32 %v687_v36, %v683_v38 }
 0x23f   : > { %v2758_v41 = vadd.f32 %v692_v39, %v688_v40 }
 0x241   : > { %v695_v42 = vsel %vm669_vm1, %v2758_v41, 0.0 }
 0x242   : > { %696 = vadd.xlane.f32.xlu1 %v695_v42 }
 0x2cb   : > { %v697_v43 = vpop.xlane.xlu1 %696 }
 0x2cc   : > { %v698_v44 = vmul.f32 0.03125, %v697_v43 }
 0x2ce   : > { %v699_v45 = vsub.f32 %v2758_v41, %v698_v44 }
 0x2d0   : > { %v700_v46 = vmul.f32 %v699_v45, %v699_v45 }
 0x2d2   : > { %v701_v47 = vsel %vm669_vm1, %v700_v46, 0.0 }
 0x2d3   : > { %702 = vadd.xlane.f32.xlu1 %v701_v47 }
 0x35c   : > { %v703_v51 = vpop.xlane.xlu1 %702 }
 0x35d   : > { %v704_v52 = vmul.f32 0.03125, %v703_v51 }
 0x35f   : > { %v705_v53 = vadd.f32 1e-05, %v704_v52 }
 0x361   : > { %2463 = vrsqrt.f32 %v705_v53 }
 0x36e   : > { %v2464_v56 = vpop.eup %2463 }
 0x36f   : > { %v707_v57 = vmul.f32 %v2464_v56, %v699_v45 }
 0x371   : > { %v712_v59 = vmul.f32 %v711_v55, %v707_v57  ;;  %v2442_v57 = vld [vmem:[%s3073_s7 + $0x8] sm:$0xff]  }
 0x372   : > { %2280 = vmatpush3.bf16.msra.mxu0 %v2442_v57 }
 0x373   : > { %v717_v60 = vadd.f32 %v716_v58, %v712_v59  ;;  %2293 = vmatprep.subr.bf16.mxu0 %v2560_v49 }
 0x375   : > { %v722_v61 = vpack.c.bf16 %v717_v60, %v717_v60 }
 0x377   : > { %2246 = vmatmul.mubr.msk.bf16.vlgmr.msra.gmra.mxu1 %vm742_vm3, %v722_v61 }
 0x378   : > { %2251 = vmatprep.mubr.msk.bf16.mxu1 %vm2561_vm2, %v2560_v49 }
 0x437   : > { %v780_v63 = vpop.f32.mrf.mxu1 }
 0x438   : > { %v781_v0 = vadd.f32 %v2111_v62, %v780_v63 }
 0x439   : > { %v2247_v1 = vpop.f32.mrf.mxu1 }
 0x43a   : > { %v2789_v2 = vpack.c.bf16 %v781_v0, %v781_v0  ;;  %v786_v7 = vmul.f32 0.25, %v781_v0 }
 0x43b   : > { %v783_v3 = vpop.f32.mrf.mxu1 }
 0x43c   : > { %795 = vrot.lane.b32.xlu0 %v2789_v2, %s2562_s21  ;;  %v792_v8 = vpack.c.bf16 %v786_v7, %v786_v7  ;;  %v2119_v3 = vld [vmem:[%s3074_s8] ss:$0 sm:$0xff] }
 0x43d   : > { %v2248_v4 = vpop.f32.mrf.mxu1 }
 0x440   : > { %970 = vrot.lane.b32.xlu0 %v2789_v2, %s2563_s23 }
 0x4ae   : > { %v796_v5 = vpop.permute.xlu0 %795 }
 0x4af   : > { %v802_v6 = vsel %vm797_vm4, %v796_v5, 0 }
 0x4b0   : > { %2250 = vmatpush3.bf16.xpose.msra.mxu1 %v802_v6 }
 0x4b1   : > { %2255 = vmatprep.subr.bf16.mxu1 %v2560_v49 }
 0x4b2   : > { %v971_v29 = vpop.permute.xlu0 %970 }
 0x4b3   : > { %v976_v34 = vsel %vm797_vm4, %v971_v29, 0 }
 0x4b7   : > { %2252 = vmatmul.mubr.msk.bf16.vlgmr.msra.gmra.mxu1 %vm797_vm4, %v792_v8 }
 0x4b8   : > { %2257 = vmatprep.mubr.msk.bf16.mxu1 %vm2561_vm2, %v2560_v49 }
 0x577   : > { %v838_v9 = vpop.f32.mrf.mxu1 }
 0x578   : > { %v845_v10 = vsel %vm844_vm5, %v838_v9, -inf }
 0x579   : > { %846 = vmax.xlane.f32.xlu1 %v845_v10  ;;  %v2253_v11 = vpop.f32.mrf.mxu1 }
 0x57b   : > { %v841_v12 = vpop.f32.mrf.mxu1 }
 0x57d   : > { %v2254_v13 = vpop.f32.mrf.mxu1 }
 0x602   : > { %v847_v14 = vpop.xlane.xlu1 %846 }
 0x603   : > { %v848_v15 = vsub.f32 %v838_v9, %v847_v14 }
 0x605   : > { %v849_v16 = vmul.f32 1.442695, %v848_v15 }
 0x607   : > { %2465 = vpow2.f32 %v849_v16 }
 0x614   : > { %v2466_v17 = vpop.eup %2465 }
 0x615   : > { %v851_v18 = vsel %vm844_vm5, %v2466_v17, 0.0 }
 0x616   : > { %852 = vadd.xlane.f32.xlu1 %v851_v18 }
 0x627   : > { %857 = vrot.lane.b32.xlu1 %v2789_v2, %s2564_s24 }
 0x62b   : > { %968 = vrot.lane.b32.xlu1 %v792_v8, %s2565_s27 }
 0x69f   : > { %v853_v21 = vpop.xlane.xlu1 %852 }
 0x6a0   : > { %2467 = vrcp.f32 %v853_v21  ;;  %v1130_v21 = vld [vmem:[%s3075_s9] sm:$0x3] }
 0x6a3   : > { %v858_v23 = vpop.permute.xlu1 %857 }
 0x6a4   : > { %v868_v24 = vand.u32 %v2805_v22, %v858_v23  ;;  %v1147_v23 = vrot.slane %v1130_v21, %v2749_v33 }
 0x6a6   : > { %2256 = vmatpush3.bf16.msra.mxu1 %v868_v24 }
 0x6a7   : > { %2261 = vmatprep.subr.bf16.mxu1 %v2560_v49  ;;  %v969_v38 = vpop.permute.xlu1 %968 }
 0x6ad   : > { %v2468_v25 = vpop.eup %2467 }
 0x6ae   : > { %v855_v26 = vmul.f32 %v2468_v25, %v2466_v17  ;;  %v2443_v17 = vld [vmem:[%s3076_s10 + $0x8] sm:$0xff]  }
 0x6b0   : > { %v856_v28 = vpack.c.bf16 %v855_v26, %v855_v26  ;;  %v1152_v26 = vrot.slane %v1130_v21, %v2754_v35 }
 0x6b2   : > { %2258 = vmatmul.mubr.msk.bf16.vlgmr.msra.gmra.mxu1 %vm859_vm8, %v856_v28 }
 0x6b3   : > { %2262 = vmatpush3.bf16.msra.mxu1 %v2441_v27  ;;  %2263 = vmatprep.mubr.msk.bf16.mxu1 %vm2561_vm2, %v2560_v49 }
 0x6b4   : > { %2267 = vmatprep.subr.bf16.mxu1 %v2560_v49 }
 0x772   : > { %v904_v30 = vpop.f32.mrf.mxu1 }
 0x773   : > { %v910_v31 = vpack.c.bf16 %v904_v30, %v904_v30  ;;  %v2445_v30 = vld [vmem:[%s3078_s12 + $0x18] sm:$0xff]  }
 0x774   : > { %v2259_v32 = vpop.f32.mrf.mxu1 }
 0x775   : > { %2264 = vmatmul.mubr.msk.bf16.vlgmr.msra.gmra.mxu1 %vm797_vm4, %v910_v31  ;;  %v2446_v31 = vld [vmem:[%s3078_s12 + $0x10] sm:$0xff]   ;;  %v2447_v32 = vld [vmem:[%s3078_s12 + $0x8] sm:$0xff]  }
 0x776   : > { %2268 = vmatpush3.bf16.xpose.msra.mxu1 %v976_v34  ;;  %v907_v36 = vpop.f32.mrf.mxu1  ;;  %2269 = vmatprep.mubr.msk.bf16.mxu1 %vm2561_vm2, %v2560_v49  ;;  %v2448_v34 = vld [vmem:[%s3078_s12] sm:$0xff]  }
 0x777   : > { %2273 = vmatprep.subr.bf16.mxu1 %v2560_v49  ;;  %v2124_v36 = vld [vmem:[%s3077_s11] ss:$0 sm:$0xff] }
 0x778   : > { %v2260_v37 = vpop.f32.mrf.mxu1 }
 0x77d   : > { %2270 = vmatmul.mubr.msk.bf16.vlgmr.msra.gmra.mxu1 %vm797_vm4, %v969_v38 }
 0x77e   : > { %2275 = vmatprep.mubr.msk.bf16.mxu1 %vm2561_vm2, %v2560_v49 }
 0x835   : > { %v954_v39 = vpop.f32.mrf.mxu1 }
 0x836   : > { %v966_v4 = vadd.f32 %v2119_v3, %v954_v39 }
 0x837   : > { %v2265_v40 = vpop.f32.mrf.mxu1 }
 0x839   : > { %v957_v42 = vpop.f32.mrf.mxu1 }
 0x83b   : > { %v2266_v43 = vpop.f32.mrf.mxu1 }
 0x83d   : > { %v1012_v44 = vpop.f32.mrf.mxu1 }
 0x83e   : > { %v1018_v45 = vsel %vm844_vm5, %v1012_v44, -inf }
 0x83f   : > { %1019 = vmax.xlane.f32.xlu0 %v1018_v45  ;;  %v2271_v46 = vpop.f32.mrf.mxu1 }
 0x841   : > { %v1015_v47 = vpop.f32.mrf.mxu1 }
 0x843   : > { %v2272_v48 = vpop.f32.mrf.mxu1 }
 0x855   : > { %1030 = vrot.lane.b32.xlu0 %v2789_v2, %s2567_s18 }
 0x8c8   : > { %v1020_v50 = vpop.xlane.xlu0 %1019 }
 0x8c9   : > { %v1021_v51 = vsub.f32 %v1012_v44, %v1020_v50 }
 0x8cb   : > { %v1022_v52 = vmul.f32 1.442695, %v1021_v51 }
 0x8cc   : > { %v1031_v53 = vpop.permute.xlu0 %1030 }
 0x8cd   : > { %2469 = vpow2.f32 %v1022_v52  ;;  %v1036_v54 = vand.u32 %v1031_v53, %v2805_v22  ;;  %v2134_v52 = vld [vmem:[%s3079_s13] ss:$0 sm:$0xff] }
 0x8cf   : > { %2274 = vmatpush3.bf16.msra.mxu1 %v1036_v54 }
 0x8d0   : > { %2285 = vmatprep.subr.bf16.mxu1 %v2560_v49 }
 0x8da   : > { %v2470_v55 = vpop.eup %2469 }
 0x8db   : > { %v1024_v56 = vsel %vm844_vm5, %v2470_v55, 0.0 }
 0x8dc   : > { %1025 = vadd.xlane.f32.xlu1 %v1024_v56 }
 0x965   : > { %v1026_v58 = vpop.xlane.xlu1 %1025 }
 0x966   : > { %2471 = vrcp.f32 %v1026_v58 }
 0x973   : > { %v2472_v59 = vpop.eup %2471 }
 0x974   : > { %v1028_v60 = vmul.f32 %v2472_v59, %v2470_v55 }
 0x976   : > { %v1029_v61 = vpack.c.bf16 %v1028_v60, %v1028_v60 }
 0x978   : > { %2276 = vmatmul.mubr.msk.bf16.vlgmr.msra.gmra.mxu1 %vm859_vm8, %v1029_v61 }
 0x979   : > { %2289 = vmatprep.mubr.msk.bf16.mxu1 %vm2561_vm2, %v2560_v49  ;;  %2286 = vmatpush3.bf16.msra.mxu1 %v2443_v17 }
 0x97a   : > { %2287 = vmatprep.subr.bf16.mxu1 %v2560_v49 }
 0xa38   : > { %v1072_v62 = vpop.f32.mrf.mxu1 }
 0xa39   : > { %v1078_v63 = vpack.c.bf16 %v1072_v62, %v1072_v62 }
 0xa3a   : > { %v2277_v0 = vpop.f32.mrf.mxu1 }
 0xa3b   : > { %2282 = vmatmul.mubr.msk.bf16.vlgmr.msra.gmra.mxu0 %vm797_vm4, %v1078_v63  ;;  %v2449_v0 = vld [vmem:[%s3071_s5 + $0x18] sm:$0xff]  }
 0xa3c   : > { %v1075_v1 = vpop.f32.mrf.mxu1  ;;  %2301 = vmatprep.mubr.msk.bf16.mxu0 %vm2561_vm2, %v2560_v49  ;;  %2294 = vmatpush3.bf16.msra.mxu0 %v2445_v30 }
 0xa3d   : > { %2295 = vmatprep.subr.bf16.mxu0 %v2560_v49  ;;  %v2450_v1 = vld [vmem:[%s3071_s5 + $0x10] sm:$0xff]  }
 0xa3e   : > { %v2278_v2 = vpop.f32.mrf.mxu1 }
 0xa40   : > { %2296 = vmatpush3.bf16.msra.mxu0 %v2446_v31 }
 0xa41   : > { %2297 = vmatprep.subr.bf16.mxu0 %v2560_v49 }
 0xa44   : > { %2298 = vmatpush3.bf16.msra.mxu0 %v2447_v32 }
 0xa45   : > { %2299 = vmatprep.subr.bf16.mxu0 %v2560_v49 }
 0xa48   : > { %2300 = vmatpush3.bf16.msra.mxu0 %v2448_v34 }
 0xa49   : > { %2319 = vmatprep.subr.bf16.mxu0 %v2560_v49 }
 0xafb   : > { %v1122_v5 = vpop.f32.mrf.mxu0 }
 0xafc   : > { %v1128_v6 = vadd.f32 %v1122_v5, %v966_v4  ;;  %v2135_v5 = vld [vmem:[%s3070_s4 + $0x2] sm:$0x3] }
 0xafd   : > { %v2283_v7 = vpop.f32.mrf.mxu0 }
 0xafe   : > { %v1129_v8 = vadd.f32 %v1128_v6, %v2758_v41  ;;  %v2444_v41 = vld [vmem:[%s3076_s10] sm:$0xff]   ;;  %v1332_v6 = vrot.slane %v2135_v5, %v2749_v33 }
 0xaff   : > { %v1125_v9 = vpop.f32.mrf.mxu0  ;;  %2288 = vmatpush3.bf16.msra.mxu1 %v2444_v41 }
 0xb00   : > { %v1131_v10 = vsel %vm669_vm1, %v1129_v8, 0.0  ;;  %2305 = vmatprep.subr.bf16.mxu1 %v2560_v49  ;;  %v1337_v9 = vrot.slane %v2135_v5, %v2754_v35 }
 0xb01   : > { %1132 = vadd.xlane.f32.xlu1 %v1131_v10  ;;  %v2284_v11 = vpop.f32.mrf.mxu0 }
 0xb8a   : > { %v1133_v12 = vpop.xlane.xlu1 %1132 }
 0xb8b   : > { %v1134_v13 = vmul.f32 0.03125, %v1133_v12 }
 0xb8d   : > { %v1135_v14 = vsub.f32 %v1129_v8, %v1134_v13  ;;  %v2141_v13 = vld [vmem:[%s3072_s6 + $0x1] ss:$0 sm:$0xff] }
 0xb8f   : > { %v1136_v15 = vmul.f32 %v1135_v14, %v1135_v14 }
 0xb91   : > { %v1137_v16 = vsel %vm669_vm1, %v1136_v15, 0.0 }
 0xb92   : > { %1138 = vadd.xlane.f32.xlu1 %v1137_v16 }
 0xc1b   : > { %v1139_v18 = vpop.xlane.xlu1 %1138 }
 0xc1c   : > { %v1140_v19 = vmul.f32 0.03125, %v1139_v18 }
 0xc1e   : > { %v1141_v20 = vadd.f32 1e-05, %v1140_v19 }
 0xc20   : > { %2473 = vrsqrt.f32 %v1141_v20 }
 0xc2d   : > { %v2474_v24 = vpop.eup %2473 }
 0xc2e   : > { %v1143_v25 = vmul.f32 %v2474_v24, %v1135_v14 }
 0xc30   : > { %v1148_v27 = vmul.f32 %v1147_v23, %v1143_v25 }
 0xc32   : > { %v1153_v28 = vadd.f32 %v1152_v26, %v1148_v27 }
 0xc34   : > { %v1158_v29 = vpack.c.bf16 %v1153_v28, %v1153_v28 }
 0xc36   : > { %2290 = vmatmul.mubr.msk.bf16.vlgmr.msra.gmra.mxu1 %vm742_vm3, %v1158_v29 }
 0xc37   : > { %2309 = vmatprep.mubr.msk.bf16.mxu1 %vm2561_vm2, %v2560_v49  ;;  %2306 = vmatpush3.bf16.msra.mxu1 %v2449_v0 }
 0xc38   : > { %2307 = vmatprep.subr.bf16.mxu1 %v2560_v49 }
 0xc3b   : > { %2308 = vmatpush3.bf16.msra.mxu1 %v2450_v1  ;;  %v2452_v1 = vld [vmem:[%s3073_s7 + $0x18] sm:$0xff]  }
 0xc3c   : > { %2313 = vmatprep.subr.bf16.mxu1 %v2560_v49 }
 0xcf6   : > { %v1215_v37 = vpop.f32.mrf.mxu1 }
 0xcf7   : > { %v1216_v38 = vadd.f32 %v2124_v36, %v1215_v37 }
 0xcf8   : > { %v2291_v39 = vpop.f32.mrf.mxu1 }
 0xcf9   : > { %v2128_v40 = vmul.f32 -1.702, %v1216_v38 }
 0xcfa   : > { %v1218_v42 = vpop.f32.mrf.mxu1 }
 0xcfb   : > { %v1223_v43 = vmul.f32 1.442695, %v2128_v40 }
 0xcfc   : > { %v2292_v44 = vpop.f32.mrf.mxu1 }
 0xcfd   : > { %2475 = vpow2.f32 %v1223_v43 }
 0xd0a   : > { %v2476_v45 = vpop.eup %2475 }
 0xd0b   : > { %v1225_v46 = vadd.f32 1.0, %v2476_v45 }
 0xd0d   : > { %2477 = vrcp.f32 %v1225_v46  ;;  %v2451_v46 = vld [vmem:[%s3073_s7 + $0x10] sm:$0xff]  }
 0xd1a   : > { %v2478_v47 = vpop.eup %2477 }
 0xd1b   : > { %v1228_v48 = vmul.f32 %v2478_v47, %v1216_v38 }
 0xd1d   : > { %v1237_v50 = vpack.c.bf16 %v1228_v48, %v1228_v48 }
 0xd1f   : > { %2302 = vmatmul.mubr.msk.bf16.vlgmr.msra.gmra.mxu0 %vm624_vm0, %v1237_v50 }
 0xd20   : > { %2321 = vmatprep.mubr.msk.bf16.mxu0 %vm2561_vm2, %v2560_v49 }
 0xddf   : > { %v1299_v51 = vpop.f32.mrf.mxu0 }
 0xde0   : > { %v1305_v53 = vadd.f32 %v1299_v51, %v1129_v8 }
 0xde1   : > { %v2303_v54 = vpop.f32.mrf.mxu0 }
 0xde2   : > { %v2887_v55 = vadd.f32 %v2134_v52, %v1305_v53 }
 0xde3   : > { %v1302_v56 = vpop.f32.mrf.mxu0 }
 0xde4   : > { %v1316_v57 = vsel %vm669_vm1, %v2887_v55, 0.0 }
 0xde5   : > { %1317 = vadd.xlane.f32.xlu1 %v1316_v57  ;;  %v2304_v58 = vpop.f32.mrf.mxu0 }
 0xe6e   : > { %v1318_v59 = vpop.xlane.xlu1 %1317 }
 0xe6f   : > { %v1319_v60 = vmul.f32 0.03125, %v1318_v59 }
 0xe71   : > { %v1320_v61 = vsub.f32 %v2887_v55, %v1319_v60 }
 0xe73   : > { %v1321_v62 = vmul.f32 %v1320_v61, %v1320_v61 }
 0xe75   : > { %v1322_v63 = vsel %vm669_vm1, %v1321_v62, 0.0 }
 0xe76   : > { %1323 = vadd.xlane.f32.xlu1 %v1322_v63 }
 0xeff   : > { %v1324_v2 = vpop.xlane.xlu1 %1323 }
 0xf00   : > { %v1325_v3 = vmul.f32 0.03125, %v1324_v2 }
 0xf02   : > { %v1326_v4 = vadd.f32 1e-05, %v1325_v3 }
 0xf04   : > { %2479 = vrsqrt.f32 %v1326_v4 }
 0xf11   : > { %v2480_v7 = vpop.eup %2479 }
 0xf12   : > { %v1328_v8 = vmul.f32 %v2480_v7, %v1320_v61 }
 0xf14   : > { %v1333_v10 = vmul.f32 %v1332_v6, %v1328_v8 }
 0xf16   : > { %v1338_v11 = vadd.f32 %v1337_v9, %v1333_v10 }
 0xf18   : > { %v1344_v12 = vpack.c.bf16 %v1338_v11, %v1338_v11 }
 0xf1a   : > { %2310 = vmatmul.mubr.msk.bf16.vlgmr.msra.gmra.mxu1 %vm742_vm3, %v1344_v12 }
 0xf1b   : > { %2315 = vmatprep.mubr.msk.bf16.mxu1 %vm2561_vm2, %v2560_v49 }
 0xfda   : > { %v1402_v14 = vpop.f32.mrf.mxu1 }
 0xfdb   : > { %v1403_v15 = vadd.f32 %v2141_v13, %v1402_v14 }
 0xfdc   : > { %v2311_v16 = vpop.f32.mrf.mxu1 }
 0xfdd   : > { %v2912_v17 = vpack.c.bf16 %v1403_v15, %v1403_v15  ;;  %v1408_v21 = vmul.f32 0.25, %v1403_v15  ;;  %v2154_v15 = vld [vmem:[%s3074_s8 + $0x1] ss:$0 sm:$0xff] }
 0xfde   : > { %v1405_v41 = vpop.f32.mrf.mxu1 }
 0xfdf   : > { %1419 = vrot.lane.b32.xlu0 %v2912_v17, %s2562_s21  ;;  %v1416_v23 = vpack.c.bf16 %v1408_v21, %v1408_v21  ;;  %s3025_s21 = scalar_lea.hbm %s3082_s16, %s2188_s28 }
 0xfe0   : > { %v2312_v18 = vpop.f32.mrf.mxu1 }
0x1051   : > { %v1420_v19 = vpop.permute.xlu0 %1419 }
0x1052   : > { %v1425_v20 = vsel %vm797_vm4, %v1420_v19, 0 }
0x1053   : > { %2314 = vmatpush3.bf16.xpose.msra.mxu1 %v1425_v20 }
0x1054   : > { %2325 = vmatprep.subr.bf16.mxu1 %v2560_v49 }
0x105a   : > { %2316 = vmatmul.mubr.msk.bf16.vlgmr.msra.gmra.mxu1 %vm797_vm4, %v1416_v23 }
0x105b   : > { %2327 = vmatprep.mubr.msk.bf16.mxu1 %vm2561_vm2, %v2560_v49  ;;  %2326 = vmatpush3.bf16.msra.mxu1 %v2451_v46  ;;  %v2457_v46 = vld [vmem:[%s3078_s12 + $0x28] sm:$0xff]  }
0x105c   : > { %2337 = vmatprep.subr.bf16.mxu1 %v2560_v49 }
0x111a   : > { %v1461_v24 = vpop.f32.mrf.mxu1 }
0x111b   : > { %v1467_v25 = vsel %vm844_vm5, %v1461_v24, -inf }
0x111c   : > { %1468 = vmax.xlane.f32.xlu1 %v1467_v25  ;;  %v2317_v26 = vpop.f32.mrf.mxu1 }
0x111e   : > { %v1464_v27 = vpop.f32.mrf.mxu1 }
0x1120   : > { %v2318_v28 = vpop.f32.mrf.mxu1 }
0x112d   : > { %1479 = vrot.lane.b32.xlu1 %v2912_v17, %s2564_s24  ;;  %s2497_s24 = scalar_lea.vmem %s3027_s29, 16 }
0x112e   : > { %p2498_p11 = scmp.ne.s32.totalorder %s3027_s29, %s2497_s24 }
0x1130   : > { %p2499_p12 = pnand %p2498_p11, %p2692_p5 }
0x1131   : > { %1587 = vrot.lane.b32.xlu1 %v2912_v17, %s2563_s23  ;;  %s2023_s23 = scalar_lea.sflag [#allocation3], %s512_s30 }
0x1132   : > { %p2500_p13 = pneg %p2499_p12 }
0x1135   : > { %1585 = vrot.lane.b32.xlu1 %v1416_v23, %s2565_s27  ;;  %s2501_s27 = sshll.u32 %s2568_s25, 4  ;;  %s2502_s27 = int_to_ptr.vmem [resolvable:$false] %s2501_s27 }
0x1136   : > { %p2504_p0 = scmp.lt.s32.totalorder %s3027_s29, %s2502_s27 }
0x11a5   : > { %v1469_v29 = vpop.xlane.xlu1 %1468 }
0x11a6   : > { %v1470_v30 = vsub.f32 %v1461_v24, %v1469_v29  ;;  %v2453_v29 = vld [vmem:[%s3076_s10 + $0x18] sm:$0xff]  }
0x11a8   : > { %v1471_v31 = vmul.f32 1.442695, %v1470_v30 }
0x11a9   : > { %v1480_v32 = vpop.permute.xlu1 %1479 }
0x11aa   : > { %2481 = vpow2.f32 %v1471_v31  ;;  %v1485_v34 = vand.u32 %v1480_v32, %v2805_v22 }
0x11ac   : > { %2320 = vmatpush3.bf16.msra.mxu0 %v1485_v34  ;;  %v2159_v34 = vld [vmem:[%s3075_s9 + $0x2] sm:$0x3] }
0x11ad   : > { %2331 = vmatprep.subr.bf16.mxu0 %v2560_v49  ;;  %v1588_v42 = vpop.permute.xlu1 %1587 }
0x11ae   : > { %v1593_v44 = vsel %vm797_vm4, %v1588_v42, 0 }
0x11b1   : > { %v1586_v45 = vpop.permute.xlu1 %1585 }
0x11b7   : > { %v2482_v36 = vpop.eup %2481 }
0x11b8   : > { %v1473_v37 = vsel %vm844_vm5, %v2482_v36, 0.0 }
0x11b9   : > { %1474 = vadd.xlane.f32.xlu0 %v1473_v37 }
0x1242   : > { %v1475_v38 = vpop.xlane.xlu0 %1474 }
0x1243   : > { %2483 = vrcp.f32 %v1475_v38 }
0x1250   : > { %v2484_v39 = vpop.eup %2483 }
0x1251   : > { %v1477_v40 = vmul.f32 %v2484_v39, %v2482_v36  ;;  %v1765_v36 = vrot.slane %v2159_v34, %v2749_v33  ;;  %v1770_v39 = vrot.slane %v2159_v34, %v2754_v35 }
0x1253   : > { %v1478_v43 = vpack.c.bf16 %v1477_v40, %v1477_v40 }
0x1255   : > { %2322 = vmatmul.mubr.msk.bf16.vlgmr.msra.gmra.mxu0 %vm859_vm8, %v1478_v43 }
0x1256   : > { %2332 = vmatpush3.bf16.xpose.msra.mxu0 %v1593_v44  ;;  %2333 = vmatprep.mubr.msk.bf16.mxu0 %vm2561_vm2, %v2560_v49  ;;  %v2455_v44 = vld [vmem:[%s3078_s12 + $0x38] sm:$0xff]  }
0x1257   : > { %2343 = vmatprep.subr.bf16.mxu0 %v2560_v49 }
0x125d   : > { %2334 = vmatmul.mubr.msk.bf16.vlgmr.msra.gmra.mxu0 %vm797_vm4, %v1586_v45  ;;  %v2456_v45 = vld [vmem:[%s3078_s12 + $0x30] sm:$0xff]  }
0x125e   : > { %2345 = vmatprep.mubr.msk.bf16.mxu0 %vm2561_vm2, %v2560_v49  ;;  %2344 = vmatpush3.bf16.msra.mxu0 %v2452_v1 }
0x125f   : > { %2357 = vmatprep.subr.bf16.mxu0 %v2560_v49 }
0x1315   : > { %v1521_v47 = vpop.f32.mrf.mxu0 }
0x1316   : > { %v1527_v48 = vpack.c.bf16 %v1521_v47, %v1521_v47  ;;  %v2458_v47 = vld [vmem:[%s3078_s12 + $0x20] sm:$0xff]  }
0x1317   : > { %v2323_v50 = vpop.f32.mrf.mxu0 }
0x1318   : > { %2328 = vmatmul.mubr.msk.bf16.vlgmr.msra.gmra.mxu1 %vm797_vm4, %v1527_v48  ;;  %v2165_v48 = vld [vmem:[%s3077_s11 + $0x1] ss:$0 sm:$0xff] }
0x1319   : > { %v1524_v51 = vpop.f32.mrf.mxu0  ;;  %2339 = vmatprep.mubr.msk.bf16.mxu1 %vm2561_vm2, %v2560_v49 }
0x131b   : > { %v2324_v52 = vpop.f32.mrf.mxu0 }
0x131d   : > { %v1629_v53 = vpop.f32.mrf.mxu0 }
0x131e   : > { %v1635_v54 = vsel %vm844_vm5, %v1629_v53, -inf }
0x131f   : > { %1636 = vmax.xlane.f32.xlu1 %v1635_v54  ;;  %v2335_v56 = vpop.f32.mrf.mxu0 }
0x1321   : > { %v1632_v57 = vpop.f32.mrf.mxu0 }
0x1323   : > { %v2336_v58 = vpop.f32.mrf.mxu0 }
0x13a8   : > { %v1637_v59 = vpop.xlane.xlu1 %1636 }
0x13a9   : > { %v1638_v60 = vsub.f32 %v1629_v53, %v1637_v59 }
0x13ab   : > { %v1639_v61 = vmul.f32 1.442695, %v1638_v60 }
0x13ad   : > { %2485 = vpow2.f32 %v1639_v61 }
0x13ba   : > { %v2486_v62 = vpop.eup %2485 }
0x13bb   : > { %v1641_v63 = vsel %vm844_vm5, %v2486_v62, 0.0 }
0x13bc   : > { %1642 = vadd.xlane.f32.xlu0 %v1641_v63 }
0x13d2   : > { %1647 = vrot.lane.b32.xlu0 %v2912_v17, %s2567_s18  ;;  %s2503_s18 = scalar_lea.vmem %s2502_s27, 32 }
0x13d3   : > { %p2505_p1 = scmp.lt.s32.totalorder %s2503_s18, %s2497_s24 }
0x13d5   : > { %p2506_p2 = por %p2505_p1, %p2504_p0 }
0x13d7   : > { %p2507_p3 = pnand %p2506_p2, %p2500_p13 }
0x13d8   : > { %v1571_v0 = vpop.f32.mrf.mxu1 }
0x13d9   : > { %v1583_v16 = vadd.f32 %v2154_v15, %v1571_v0  ;;  %v2184_v0 = vld [vmem:[%s3079_s13 + $0x1] ss:$0 sm:$0xff] }
0x13da   : > { %v2329_v2 = vpop.f32.mrf.mxu1 }
0x13dc   : > { %v1574_v3 = vpop.f32.mrf.mxu1 }
0x13de   : > { %v2330_v4 = vpop.f32.mrf.mxu1 }
0x1445   : > { %v1643_v5 = vpop.xlane.xlu0 %1642 }
0x1446   : > { %2487 = vrcp.f32 %v1643_v5 }
0x1449   : > { %v1648_v6 = vpop.permute.xlu0 %1647 }
0x144a   : > { %v1653_v7 = vand.u32 %v1648_v6, %v2805_v22 }
0x144c   : > { %2338 = vmatpush3.bf16.msra.mxu1 %v1653_v7 }
0x144d   : > { %2349 = vmatprep.subr.bf16.mxu1 %v2560_v49 }
0x1453   : > { %v2488_v8 = vpop.eup %2487 }
0x1454   : > { %v1645_v9 = vmul.f32 %v2488_v8, %v2486_v62 }
0x1456   : > { %v1646_v10 = vpack.c.bf16 %v1645_v9, %v1645_v9 }
0x1458   : > { %2340 = vmatmul.mubr.msk.bf16.vlgmr.msra.gmra.mxu1 %vm859_vm8, %v1646_v10 }
0x1459   : > { %2353 = vmatprep.mubr.msk.bf16.mxu1 %vm2561_vm2, %v2560_v49  ;;  %2350 = vmatpush3.bf16.msra.mxu1 %v2453_v29 }
0x145a   : > { %2351 = vmatprep.subr.bf16.mxu1 %v2560_v49 }
0x1518   : > { %v1689_v11 = vpop.f32.mrf.mxu1 }
0x1519   : > { %v1695_v12 = vpack.c.bf16 %v1689_v11, %v1689_v11 }
0x151a   : > { %v2341_v13 = vpop.f32.mrf.mxu1 }
0x151b   : > { %2346 = vmatmul.mubr.msk.bf16.vlgmr.msra.gmra.mxu0 %vm797_vm4, %v1695_v12  ;;  %v2459_v12 = vld [vmem:[%s3081_s15 + $0x8] sm:$0xff]   ;;  %v2460_v13 = vld [vmem:[%s3081_s15] sm:$0xff]  }
0x151c   : > { %v1692_v14 = vpop.f32.mrf.mxu1  ;;  %2365 = vmatprep.mubr.msk.bf16.mxu0 %vm2561_vm2, %v2560_v49  ;;  %2358 = vmatpush3.bf16.msra.mxu0 %v2455_v44 }
0x151d   : > { %2359 = vmatprep.subr.bf16.mxu0 %v2560_v49 }
0x151e   : > { %v2342_v22 = vpop.f32.mrf.mxu1 }
0x1520   : > { %2360 = vmatpush3.bf16.msra.mxu0 %v2456_v45 }
0x1521   : > { %2361 = vmatprep.subr.bf16.mxu0 %v2560_v49 }
0x1524   : > { %2362 = vmatpush3.bf16.msra.mxu0 %v2457_v46 }
0x1525   : > { %2363 = vmatprep.subr.bf16.mxu0 %v2560_v49 }
0x1528   : > { %2364 = vmatpush3.bf16.msra.mxu0 %v2458_v47 }
0x15db   : > { %v1739_v17 = vpop.f32.mrf.mxu0 }
0x15dc   : > { %v1745_v41 = vadd.f32 %v1739_v17, %v1583_v16  ;;  %v1936_v16 = vld [vmem:[%s3080_s14] sm:$0x3] }
0x15dd   : > { %v2347_v18 = vpop.f32.mrf.mxu0  ;;  %v1953_v17 = vrot.slane %v1936_v16, %v2749_v33 }
0x15de   : > { %v1746_v19 = vadd.f32 %v1745_v41, %v2887_v55  ;;  %v2454_v55 = vld [vmem:[%s3076_s10 + $0x10] sm:$0xff]  }
0x15df   : > { %v1742_v20 = vpop.f32.mrf.mxu0  ;;  %2352 = vmatpush3.bf16.msra.mxu1 %v2454_v55 }
0x15e0   : > { %v1749_v21 = vsel %vm669_vm1, %v1746_v19, 0.0  ;;  %2369 = vmatprep.subr.bf16.mxu1 %v2560_v49 }
0x15e1   : > { %1750 = vadd.xlane.f32.xlu0 %v1749_v21  ;;  %v2348_v23 = vpop.f32.mrf.mxu0 }
0x166a   : > { %v1751_v24 = vpop.xlane.xlu0 %1750 }
0x166b   : > { %v1752_v25 = vmul.f32 0.03125, %v1751_v24 }
0x166d   : > { %v1753_v26 = vsub.f32 %v1746_v19, %v1752_v25 }
0x166f   : > { %v1754_v27 = vmul.f32 %v1753_v26, %v1753_v26 }
0x1671   : > { %v1755_v28 = vsel %vm669_vm1, %v1754_v27, 0.0 }
0x1672   : > { %1756 = vadd.xlane.f32.xlu1 %v1755_v28 }
0x16fb   : > { %v1757_v30 = vpop.xlane.xlu1 %1756 }
0x16fc   : > { %v1758_v31 = vmul.f32 0.03125, %v1757_v30 }
0x16fe   : > { %v1759_v32 = vadd.f32 1e-05, %v1758_v31 }
0x1700   : > { %2489 = vrsqrt.f32 %v1759_v32 }
0x170d   : > { %v2490_v37 = vpop.eup %2489 }
0x170e   : > { %v1761_v38 = vmul.f32 %v2490_v37, %v1753_v26 }
0x1710   : > { %v1766_v40 = vmul.f32 %v1765_v36, %v1761_v38 }
0x1712   : > { %v1771_v42 = vadd.f32 %v1770_v39, %v1766_v40 }
0x1714   : > { %v1777_v43 = vpack.c.bf16 %v1771_v42, %v1771_v42 }
0x1716   : > { %2354 = vmatmul.mubr.msk.bf16.vlgmr.msra.gmra.mxu1 %vm742_vm3, %v1777_v43 }
0x1717   : > { %2373 = vmatprep.mubr.msk.bf16.mxu1 %vm2561_vm2, %v2560_v49  ;;  %2370 = vmatpush3.bf16.msra.mxu1 %v2459_v12 }
0x1718   : > { %2371 = vmatprep.subr.bf16.mxu1 %v2560_v49 }
0x171b   : > { %2372 = vmatpush3.bf16.msra.mxu1 %v2460_v13 }
0x17d6   : > { %v1835_v50 = vpop.f32.mrf.mxu1 }
0x17d7   : > { %v1836_v51 = vadd.f32 %v2165_v48, %v1835_v50 }
0x17d8   : > { %v2355_v52 = vpop.f32.mrf.mxu1 }
0x17d9   : > { %v2169_v53 = vmul.f32 -1.702, %v1836_v51 }
0x17da   : > { %v1838_v54 = vpop.f32.mrf.mxu1 }
0x17db   : > { %v1843_v56 = vmul.f32 1.442695, %v2169_v53 }
0x17dc   : > { %v2356_v57 = vpop.f32.mrf.mxu1 }
0x17dd   : > { %2491 = vpow2.f32 %v1843_v56 }
0x17ea   : > { %v2492_v58 = vpop.eup %2491 }
0x17eb   : > { %v1845_v59 = vadd.f32 1.0, %v2492_v58 }
0x17ed   : > { %2493 = vrcp.f32 %v1845_v59 }
0x17fa   : > { %v2494_v60 = vpop.eup %2493 }
0x17fb   : > { %v1848_v61 = vmul.f32 %v2494_v60, %v1836_v51 }
0x17fd   : > { %v1858_v62 = vpack.c.bf16 %v1848_v61, %v1848_v61 }
0x17ff   : > { %2366 = vmatmul.mubr.msk.bf16.vlgmr.msra.gmra.mxu0 %vm624_vm0, %v1858_v62 }
0x18bf   : > { %v1920_v63 = vpop.f32.mrf.mxu0 }
0x18c0   : > { %v1926_v1 = vadd.f32 %v1920_v63, %v1746_v19  ;;  %v1958_v19 = vrot.slane %v1936_v16, %v2754_v35 }
0x18c1   : > { %v2367_v2 = vpop.f32.mrf.mxu0 }
0x18c2   : > { %v1935_v3 = vadd.f32 %v2184_v0, %v1926_v1 }
0x18c3   : > { %v1923_v4 = vpop.f32.mrf.mxu0 }
0x18c4   : > { %v1937_v5 = vsel %vm669_vm1, %v1935_v3, 0.0 }
0x18c5   : > { %1938 = vadd.xlane.f32.xlu1 %v1937_v5  ;;  %v2368_v6 = vpop.f32.mrf.mxu0 }
0x194e   : > { %v1939_v7 = vpop.xlane.xlu1 %1938 }
0x194f   : > { %v1940_v8 = vmul.f32 0.03125, %v1939_v7 }
0x1951   : > { %v1941_v9 = vsub.f32 %v1935_v3, %v1940_v8 }
0x1953   : > { %v1942_v10 = vmul.f32 %v1941_v9, %v1941_v9 }
0x1955   : > { %v1943_v11 = vsel %vm669_vm1, %v1942_v10, 0.0 }
0x1956   : > { %1944 = vadd.xlane.f32.xlu1 %v1943_v11 }
0x19df   : > { %v1945_v14 = vpop.xlane.xlu1 %1944 }
0x19e0   : > { %v1946_v22 = vmul.f32 0.03125, %v1945_v14 }
0x19e2   : > { %v1947_v15 = vadd.f32 1e-05, %v1946_v22 }
0x19e4   : > { %2495 = vrsqrt.f32 %v1947_v15 }
0x19f1   : > { %v2496_v41 = vpop.eup %2495 }
0x19f2   : > { %v1949_v18 = vmul.f32 %v2496_v41, %v1941_v9 }
0x19f4   : > { %v1954_v20 = vmul.f32 %v1953_v17, %v1949_v18 }
0x19f6   : > { %v1959_v21 = vadd.f32 %v1958_v19, %v1954_v20 }
0x19f8   : > { %v1964_v49 = vpack.c.bf16 %v1959_v21, %v1959_v21 }
0x19fa   : > { %2374 = vmatmul.mubr.msk.bf16.vlgmr.msra.gmra.mxu1 %vm742_vm3, %v1964_v49 }
0x1aba   : > { %v2014_v33 = vpop.f32.mrf.mxu1 }
0x1abb   : > { %2021 = vst.msk [vmem:[%s513_s17] sm:$0x1] %vm2020_vm9, %v2014_v33 }
0x1abc   : > { %v2375_v35 = vpop.f32.mrf.mxu1 }
0x1abd   : > { %2510 = shalt.err (!%p2507_p3)
}
0x1abe   : > { %s2511_s26 = scalar_lea.hbm %s3025_s21, 16  ;;  %s2515_s17 = scalar_lea.hbm %s3082_s16, 64 }
0x1abf   : > { %p2512_p4 = scmp.ne.s32.totalorder %s3025_s21, %s2511_s26  ;;  %p2516_p9 = scmp.lt.s32.totalorder %s3025_s21, %s3082_s16 }
0x1ac0   : > { %p2517_p10 = scmp.lt.s32.totalorder %s2515_s17, %s2511_s26 }
0x1ac1   : > { %p2513_p7 = pnand %p2512_p4, %p2692_p5 }
0x1ac2   : > { %p2518_p11 = por %p2517_p10, %p2516_p9 }
0x1ac3   : > { %p2514_p8 = pneg %p2513_p7 }
0x1ac5   : > { %p2519_p12 = pnand %p2518_p11, %p2514_p8 }
0x1ac7   : > { %2522 = shalt.err (!%p2519_p12)
}
0x1ac8   : > { %2377 = dma.vmem_to_hbm [thread:$0]  (%p2692_p5), %s3027_s29, 16, %s3025_s21, %s2023_s23   ;;  %v2017_v23 = vpop.f32.mrf.mxu1 }
0x1aca   : > { %v2376_v24 = vpop.f32.mrf.mxu1 }
0x1acb PF: > { %s3099_s24 = sld [smem:[#allocation7_spill]] }
0x1acc   : > { %s3100_s25 = sld [smem:[#allocation5_spill]] }
0x1ad1   : > { %p2383_p13 = scmp.ge.s32.totalorder %s3099_s24, 2 }
0x1ad2   : > { %s2047_s18 = sand.u32 1, %s3100_s25  }
0x1ad3   : > { %p2380_p0 = pnand %p2383_p13, %p2696_p6  ;;  %s2048_s26 = scalar_lea.sflag [#allocation3], %s2047_s18 }
0x1ad5   : > { %p2381_p1 = pneg %p2380_p0 }
0x1ad7   : > { %2540 = dma.done.wait (%p2381_p1), %s2048_s26, 16  }
0x1ad8   : > { %2542 = vsyncadd (%p2381_p1), %s2048_s26, 4294967280  ;;  %s3102_s24 = sld [smem:[#allocation8_spill]]  ;;  %s3105_s21 = smov %s2549_s22 }
0x1ad9   : > { %s3103_s0 = sld [smem:[#allocation6_spill]] }
0x1ada   : > { %s3104_s23 = sld [smem:[#allocation9_spill]] }
0x1ade   : > { %p26_p5 = scmp.ge.s32.totalorder %s3102_s24, 6  }
0x1adf   : > { %s3106_s22 = smov %s3103_s0 }
0x1ae0   :  { %28 = sbr.rel (!%p26_p5) target bundleno = 5 (0x5), region = 129 }
0x1ae5   :  { %2052 = vsyncpa [#allocation3], 1 }
0x1ae6   :  { %2054 = vsyncpa [#allocation3 + $0x1], 1 }

</bundles_post_ra>
